<compile_context>
chip_gen: v6e
topology: v6e:2x2x1
jax: 0.10.0
libtpu: 0.0.40
codegen_flags: <defaults>
</compile_context>

<pallas_src>
import jax
import jax.numpy as jnp
import numpy as np
from jax.experimental import pallas as pl
from jax.experimental.pallas import tpu as pltpu


def _gconv_fused_kernel(x_ref, adj_ref, w_ref, b_ref, gx_ref, gh_ref, gb_ref,
                        o_ref, ah_ref):
    """All GConvLayers for one packed batch group, feature-major on-chip.

    x_ref   : (D, M)      input features, feature-major, M = Bb*N (lane dim)
    adj_ref : (Bb, N, N)  per-batch adjacency, pre-TRANSPOSED, bf16
    w_ref   : (L, H, D)   W.weight (PyTorch layout), stacked over layers, bf16
    b_ref   : (L, H, 1)   W.bias as column vectors, f32
    gx_ref  : (L, D, 1)   gate.weight[:, :D] as columns, f32
    gh_ref  : (L, H, 1)   gate.weight[:, D:] as columns, f32
    gb_ref  : (L,)        gate.bias scalars, SMEM
    o_ref   : (H, M)      output, feature-major (lane-dense store)
    ah_ref  : (H, M)      VMEM scratch — assembly slab for per-batch adj@h
    """
    Bb, N, _ = adj_ref.shape
    L = w_ref.shape[0]
    x = x_ref[...]                                    # (D, M) f32, resident

    # TODO(synk): dropout is a no-op here (inference semantics); training-mode
    # dropout would need pltpu.prng_seed / pltpu.prng_random_bits.
    def layer(l, x):
        # h^T = W @ x^T : (H, D) @ (D, M) -> (H, M); bf16 MXU operands,
        # f32 accumulation; 128-wide output lane dim.
        h = jnp.dot(w_ref[l], x.astype(jnp.bfloat16),
                    preferred_element_type=jnp.float32) + b_ref[l]
        hb = h.astype(jnp.bfloat16)
        # per-batch (adj @ h)^T = h^T @ adj^T (adjacency already transposed in
        # the wrapper), assembled into the lane-dense (H, M) scratch slab.
        for bi in range(Bb):
            ah_ref[:, bi * N:(bi + 1) * N] = jnp.dot(
                hb[:, bi * N:(bi + 1) * N], adj_ref[bi],
                preferred_element_type=jnp.float32)
        ah = jnp.maximum(ah_ref[...], 0.0)            # relu, f32 on the VPU
        # gate: one fused cross-sublane reduce for both the x- and h- halves.
        logit = (jnp.sum(x * gx_ref[l] + ah * gh_ref[l], axis=0, keepdims=True)
                 + gb_ref[l])                         # (1, M)
        coeff = jax.nn.sigmoid(logit)                 # broadcasts over features
        return ah + coeff * (x - ah)                  # residual mix (D == H)

    if L <= 4:                                        # small L: static unroll
        for l in range(L):
            x = layer(l, x)
    else:                                             # deep stacks: bound live ranges
        x = jax.lax.fori_loop(0, L, layer, x, unroll=False)

    o_ref[...] = x.astype(o_ref.dtype)                # lane-dense (H, M) store


def _pick_batch_block(B, N):
    """Smallest divisor Bb of B with Bb*N a multiple of 128 (lane-dense blocks),
    preferring >= 2 grid steps so both v7x TensorCores get work."""
    lane_ok = [d for d in range(1, B + 1) if B % d == 0 and (d * N) % 128 == 0]
    for d in lane_ok:
        if B // d >= 2:
            return d
    if lane_ok:
        return lane_ok[0]
    return B                                          # fallback: full-array block


def _vmem_limit_bytes(Bb, N, D, H, L):
    m = Bb * N
    need = (2 * D * m * 4            # double-buffered x block (f32)
            + 2 * Bb * N * N * 2     # double-buffered adjacency block (bf16)
            + 2 * H * m * 4          # double-buffered output block (f32)
            + L * (H * D * 2 + (2 * H + D) * 4)   # single-buffered weights
            + H * m * 4)             # assembly scratch
    # 4x headroom for compiler temporaries; stay under v7x's 64 MiB part.
    return int(min(max(4 * need, 16 << 20), 48 << 20))


def gconv_forward(x, adj, w_t, b, gw, gb):
    """x: (B, N, D) f32, adj: (B, N, N) bool.  Params in PyTorch layouts,
    stacked over layers: w_t (L, H, D), b (L, H), gw (L, 1, D+H), gb (L, 1)."""
    B, N, D = x.shape
    L, H, D_in = w_t.shape
    # Residual mix coeff*x + (1-coeff)*h requires node_size == hidden_size.
    assert D == D_in == H, "GConv residual mix requires node_size == hidden_size"

    Bb = _pick_batch_block(B, N)
    M = Bb * N

    # Layout / dtype plumbing in the wrapper (cheap XLA ops):
    x_fm = x.reshape(B * N, D).T                        # (D, B*N) feature-major
    adj_t = jnp.swapaxes(adj, -1, -2).astype(jnp.bfloat16)   # (B, N, N), adj^T
    w_bf = w_t.astype(jnp.bfloat16)                     # (L, H, D) MXU operand
    b_col = b.reshape(L, H, 1).astype(jnp.float32)
    gx_col = gw[:, 0, :D].reshape(L, D, 1).astype(jnp.float32)
    gh_col = gw[:, 0, D:].reshape(L, H, 1).astype(jnp.float32)
    gb_s = gb.reshape(L).astype(jnp.float32)

    const = lambda i: (0, 0, 0)                         # grid-invariant weights
    out_fm = pl.pallas_call(
        _gconv_fused_kernel,
        out_shape=jax.ShapeDtypeStruct((H, B * N), x.dtype),
        grid_spec=pltpu.PrefetchScalarGridSpec(
            num_scalar_prefetch=0,
            grid=(B // Bb,),
            in_specs=[
                pl.BlockSpec((D, M), lambda i: (0, i)),                 # x (fm)
                pl.BlockSpec((Bb, N, N), lambda i: (i, 0, 0)),          # adj^T bf16
                pl.BlockSpec((L, H, D), const, pipeline_mode=pl.Buffered(1)),
                pl.BlockSpec((L, H, 1), const, pipeline_mode=pl.Buffered(1)),
                pl.BlockSpec((L, D, 1), const, pipeline_mode=pl.Buffered(1)),
                pl.BlockSpec((L, H, 1), const, pipeline_mode=pl.Buffered(1)),
                pl.BlockSpec(memory_space=pltpu.MemorySpace.SMEM),      # gate bias
            ],
            out_specs=pl.BlockSpec((H, M), lambda i: (0, i)),
            scratch_shapes=[pltpu.VMEM((H, M), jnp.float32)],
        ),
        compiler_params=pltpu.CompilerParams(
            dimension_semantics=("parallel",),
            vmem_limit_bytes=_vmem_limit_bytes(Bb, N, D, H, L)),
    )(x_fm, adj_t, w_bf, b_col, gx_col, gh_col, gb_s)

    return out_fm.T.reshape(B, N, H)                    # back to (B, N, H)


def gconv_ref(x, adj, w_t, b, gw, gb):
    """Pure-JAX f32 reference matching the PyTorch module (eval mode)."""
    a = adj.astype(jnp.float32)
    _x = x
    L, H, D = w_t.shape
    for l in range(L):
        h = _x @ w_t[l].T + b[l]                                   # (B, N, H)
        h = jax.nn.relu(jnp.einsum('bjk,bkl->bjl', a, h))
        logit = jnp.concatenate([_x, h], -1) @ gw[l].T + gb[l]     # (B, N, 1)
        coeff = jax.nn.sigmoid(logit)
        _x = coeff * _x + (1.0 - coeff) * h
    return _x


def init_gconv_params(key, node_size, hidden_size, n_layer):
    """Deterministic params in PyTorch layouts, stacked over layers (f32)."""
    assert node_size == hidden_size, "residual mix requires node_size == hidden_size"
    ws, bs, gws, gbs = [], [], [], []
    d_in = node_size
    for _ in range(n_layer):
        key, k1, k2, k3, k4 = jax.random.split(key, 5)
        ws.append(jax.random.normal(k1, (hidden_size, d_in), jnp.float32) * 0.1)
        bs.append(jax.random.normal(k2, (hidden_size,), jnp.float32) * 0.1)
        gws.append(jax.random.normal(k3, (1, d_in + hidden_size), jnp.float32) * 0.1)
        gbs.append(jax.random.normal(k4, (1,), jnp.float32) * 0.1)
        d_in = hidden_size
    return jnp.stack(ws), jnp.stack(bs), jnp.stack(gws), jnp.stack(gbs)


if __name__ == "__main__":
    key = jax.random.PRNGKey(0)
    B, N = 16, 16           # batch, nodes  -> packed groups of 8 (128 lanes), 2 grid steps
    node_size = 32          # residual mix requires node_size == hidden_size
    hidden_size = 32
    n_layer = 2

    kx, ka, kp = jax.random.split(key, 3)
    x = jax.random.normal(kx, (B, N, node_size), jnp.float32)
    adj = jax.random.bernoulli(ka, 0.3, (B, N, N))       # BoolTensor adjacency

    params = init_gconv_params(kp, node_size, hidden_size, n_layer)

    out = jax.jit(gconv_forward)(x, adj, *params)
    jax.block_until_ready(out)
    assert out.shape == (B, N, hidden_size)

    ref = gconv_ref(x, adj, *params)
    # Tolerance loosened vs 1e-5: kernel uses bf16 MXU operands (f32 accumulation).
    np.testing.assert_allclose(np.asarray(out), np.asarray(ref),
                               rtol=5e-2, atol=5e-2)
    print("KERNEL_OK")
</pallas_src>

<mosaic_0001>
module attributes {stable_mosaic.version = 11 : i64} {
  func.func @_gconv_fused_kernel(%arg0: i32, %arg1: memref<32x128xf32, #tpu.memory_space<vmem>>, %arg2: memref<8x16x16xbf16, #tpu.memory_space<vmem>>, %arg3: memref<2x32x32xbf16, #tpu.memory_space<vmem>>, %arg4: memref<2x32x1xf32, #tpu.memory_space<vmem>>, %arg5: memref<2x32x1xf32, #tpu.memory_space<vmem>>, %arg6: memref<2x32x1xf32, #tpu.memory_space<vmem>>, %arg7: memref<2xf32, #tpu.memory_space<smem>>, %arg8: memref<32x128xf32, #tpu.memory_space<vmem>>, %arg9: memref<32x128xf32, #tpu.memory_space<vmem>>) attributes {dimension_semantics = [#tpu.dimension_semantics<parallel>], iteration_bounds = array<i64: 2>, scalar_prefetch = 0 : i64, scratch_operands = 1 : i64, tpu.core_type = #tpu.core_type<tc>, window_params = [{transform_indices = @transform_0, window_bounds = array<i64: 32, 128>}, {transform_indices = @transform_1, window_bounds = array<i64: 8, 16, 16>}, {pipeline_mode = #tpu.pipeline_mode<synchronous>, transform_indices = @transform_2, window_bounds = array<i64: 2, 32, 32>}, {pipeline_mode = #tpu.pipeline_mode<synchronous>, transform_indices = @transform_3, window_bounds = array<i64: 2, 32, 1>}, {pipeline_mode = #tpu.pipeline_mode<synchronous>, transform_indices = @transform_4, window_bounds = array<i64: 2, 32, 1>}, {pipeline_mode = #tpu.pipeline_mode<synchronous>, transform_indices = @transform_5, window_bounds = array<i64: 2, 32, 1>}, {transform_indices = @transform_6, window_bounds = array<i64: 2>}, {transform_indices = @transform_7, window_bounds = array<i64: 32, 128>}]} {
    %c0 = arith.constant 0 : index
    %c0_0 = arith.constant 0 : index
    %0 = vector.load %arg1[%c0, %c0_0] : memref<32x128xf32, #tpu.memory_space<vmem>>, vector<32x128xf32>
    %c0_1 = arith.constant 0 : index
    %c0_2 = arith.constant 0 : index
    %c0_3 = arith.constant 0 : index
    %1 = vector.load %arg3[%c0_1, %c0_2, %c0_3] : memref<2x32x32xbf16, #tpu.memory_space<vmem>>, vector<1x32x32xbf16>
    %2 = vector.shape_cast %1 : vector<1x32x32xbf16> to vector<32x32xbf16>
    %3 = arith.truncf %0 : vector<32x128xf32> to vector<32x128xbf16>
    %cst = arith.constant dense<0.000000e+00> : vector<32x128xf32>
    %4 = tpu.matmul %2, %3, %cst {dimension_numbers = #tpu.dot_dimension_numbers<[1], [0], [0], [1], [0, 0, 1, 1], [], []>} : vector<32x32xbf16>, vector<32x128xbf16>, vector<32x128xf32> -> vector<32x128xf32>
    %c0_4 = arith.constant 0 : index
    %c0_5 = arith.constant 0 : index
    %c0_6 = arith.constant 0 : index
    %5 = vector.load %arg4[%c0_4, %c0_5, %c0_6] : memref<2x32x1xf32, #tpu.memory_space<vmem>>, vector<1x32x1xf32>
    %6 = vector.shape_cast %5 : vector<1x32x1xf32> to vector<32x1xf32>
    %7 = vector.broadcast %6 : vector<32x1xf32> to vector<32x128xf32>
    %8 = arith.addf %4, %7 : vector<32x128xf32>
    %9 = arith.truncf %8 : vector<32x128xf32> to vector<32x128xbf16>
    %10 = vector.extract_strided_slice %9 {offsets = [0, 0], sizes = [32, 16], strides = [1, 1]} : vector<32x128xbf16> to vector<32x16xbf16>
    %c0_7 = arith.constant 0 : index
    %c0_8 = arith.constant 0 : index
    %c0_9 = arith.constant 0 : index
    %11 = vector.load %arg2[%c0_7, %c0_8, %c0_9] : memref<8x16x16xbf16, #tpu.memory_space<vmem>>, vector<1x16x16xbf16>
    %12 = vector.shape_cast %11 : vector<1x16x16xbf16> to vector<16x16xbf16>
    %cst_10 = arith.constant dense<0.000000e+00> : vector<32x16xf32>
    %13 = tpu.matmul %10, %12, %cst_10 {dimension_numbers = #tpu.dot_dimension_numbers<[1], [0], [0], [1], [0, 0, 1, 1], [], []>} : vector<32x16xbf16>, vector<16x16xbf16>, vector<32x16xf32> -> vector<32x16xf32>
    %c0_11 = arith.constant 0 : index
    %c0_12 = arith.constant 0 : index
    %14 = vector.load %arg9[%c0_11, %c0_12] : memref<32x128xf32, #tpu.memory_space<vmem>>, vector<32x16xf32>
    tpu.vector_store %arg9[%c0_11, %c0_12], %13 {strides = array<i32>} : memref<32x128xf32, #tpu.memory_space<vmem>>, vector<32x16xf32>,
    %15 = vector.extract_strided_slice %9 {offsets = [0, 16], sizes = [32, 16], strides = [1, 1]} : vector<32x128xbf16> to vector<32x16xbf16>
    %c1 = arith.constant 1 : index
    %c0_13 = arith.constant 0 : index
    %c0_14 = arith.constant 0 : index
    %16 = vector.load %arg2[%c1, %c0_13, %c0_14] : memref<8x16x16xbf16, #tpu.memory_space<vmem>>, vector<1x16x16xbf16>
    %17 = vector.shape_cast %16 : vector<1x16x16xbf16> to vector<16x16xbf16>
    %cst_15 = arith.constant dense<0.000000e+00> : vector<32x16xf32>
    %18 = tpu.matmul %15, %17, %cst_15 {dimension_numbers = #tpu.dot_dimension_numbers<[1], [0], [0], [1], [0, 0, 1, 1], [], []>} : vector<32x16xbf16>, vector<16x16xbf16>, vector<32x16xf32> -> vector<32x16xf32>
    %c0_16 = arith.constant 0 : index
    %c16 = arith.constant 16 : index
    %19 = vector.load %arg9[%c0_16, %c16] : memref<32x128xf32, #tpu.memory_space<vmem>>, vector<32x16xf32>
    tpu.vector_store %arg9[%c0_16, %c16], %18 {strides = array<i32>} : memref<32x128xf32, #tpu.memory_space<vmem>>, vector<32x16xf32>,
    %20 = vector.extract_strided_slice %9 {offsets = [0, 32], sizes = [32, 16], strides = [1, 1]} : vector<32x128xbf16> to vector<32x16xbf16>
    %c2 = arith.constant 2 : index
    %c0_17 = arith.constant 0 : index
    %c0_18 = arith.constant 0 : index
    %21 = vector.load %arg2[%c2, %c0_17, %c0_18] : memref<8x16x16xbf16, #tpu.memory_space<vmem>>, vector<1x16x16xbf16>
    %22 = vector.shape_cast %21 : vector<1x16x16xbf16> to vector<16x16xbf16>
    %cst_19 = arith.constant dense<0.000000e+00> : vector<32x16xf32>
    %23 = tpu.matmul %20, %22, %cst_19 {dimension_numbers = #tpu.dot_dimension_numbers<[1], [0], [0], [1], [0, 0, 1, 1], [], []>} : vector<32x16xbf16>, vector<16x16xbf16>, vector<32x16xf32> -> vector<32x16xf32>
    %c0_20 = arith.constant 0 : index
    %c32 = arith.constant 32 : index
    %24 = vector.load %arg9[%c0_20, %c32] : memref<32x128xf32, #tpu.memory_space<vmem>>, vector<32x16xf32>
    tpu.vector_store %arg9[%c0_20, %c32], %23 {strides = array<i32>} : memref<32x128xf32, #tpu.memory_space<vmem>>, vector<32x16xf32>,
    %25 = vector.extract_strided_slice %9 {offsets = [0, 48], sizes = [32, 16], strides = [1, 1]} : vector<32x128xbf16> to vector<32x16xbf16>
    %c3 = arith.constant 3 : index
    %c0_21 = arith.constant 0 : index
    %c0_22 = arith.constant 0 : index
    %26 = vector.load %arg2[%c3, %c0_21, %c0_22] : memref<8x16x16xbf16, #tpu.memory_space<vmem>>, vector<1x16x16xbf16>
    %27 = vector.shape_cast %26 : vector<1x16x16xbf16> to vector<16x16xbf16>
    %cst_23 = arith.constant dense<0.000000e+00> : vector<32x16xf32>
    %28 = tpu.matmul %25, %27, %cst_23 {dimension_numbers = #tpu.dot_dimension_numbers<[1], [0], [0], [1], [0, 0, 1, 1], [], []>} : vector<32x16xbf16>, vector<16x16xbf16>, vector<32x16xf32> -> vector<32x16xf32>
    %c0_24 = arith.constant 0 : index
    %c48 = arith.constant 48 : index
    %29 = vector.load %arg9[%c0_24, %c48] : memref<32x128xf32, #tpu.memory_space<vmem>>, vector<32x16xf32>
    tpu.vector_store %arg9[%c0_24, %c48], %28 {strides = array<i32>} : memref<32x128xf32, #tpu.memory_space<vmem>>, vector<32x16xf32>,
    %30 = vector.extract_strided_slice %9 {offsets = [0, 64], sizes = [32, 16], strides = [1, 1]} : vector<32x128xbf16> to vector<32x16xbf16>
    %c4 = arith.constant 4 : index
    %c0_25 = arith.constant 0 : index
    %c0_26 = arith.constant 0 : index
    %31 = vector.load %arg2[%c4, %c0_25, %c0_26] : memref<8x16x16xbf16, #tpu.memory_space<vmem>>, vector<1x16x16xbf16>
    %32 = vector.shape_cast %31 : vector<1x16x16xbf16> to vector<16x16xbf16>
    %cst_27 = arith.constant dense<0.000000e+00> : vector<32x16xf32>
    %33 = tpu.matmul %30, %32, %cst_27 {dimension_numbers = #tpu.dot_dimension_numbers<[1], [0], [0], [1], [0, 0, 1, 1], [], []>} : vector<32x16xbf16>, vector<16x16xbf16>, vector<32x16xf32> -> vector<32x16xf32>
    %c0_28 = arith.constant 0 : index
    %c64 = arith.constant 64 : index
    %34 = vector.load %arg9[%c0_28, %c64] : memref<32x128xf32, #tpu.memory_space<vmem>>, vector<32x16xf32>
    tpu.vector_store %arg9[%c0_28, %c64], %33 {strides = array<i32>} : memref<32x128xf32, #tpu.memory_space<vmem>>, vector<32x16xf32>,
    %35 = vector.extract_strided_slice %9 {offsets = [0, 80], sizes = [32, 16], strides = [1, 1]} : vector<32x128xbf16> to vector<32x16xbf16>
    %c5 = arith.constant 5 : index
    %c0_29 = arith.constant 0 : index
    %c0_30 = arith.constant 0 : index
    %36 = vector.load %arg2[%c5, %c0_29, %c0_30] : memref<8x16x16xbf16, #tpu.memory_space<vmem>>, vector<1x16x16xbf16>
    %37 = vector.shape_cast %36 : vector<1x16x16xbf16> to vector<16x16xbf16>
    %cst_31 = arith.constant dense<0.000000e+00> : vector<32x16xf32>
    %38 = tpu.matmul %35, %37, %cst_31 {dimension_numbers = #tpu.dot_dimension_numbers<[1], [0], [0], [1], [0, 0, 1, 1], [], []>} : vector<32x16xbf16>, vector<16x16xbf16>, vector<32x16xf32> -> vector<32x16xf32>
    %c0_32 = arith.constant 0 : index
    %c80 = arith.constant 80 : index
    %39 = vector.load %arg9[%c0_32, %c80] : memref<32x128xf32, #tpu.memory_space<vmem>>, vector<32x16xf32>
    tpu.vector_store %arg9[%c0_32, %c80], %38 {strides = array<i32>} : memref<32x128xf32, #tpu.memory_space<vmem>>, vector<32x16xf32>,
    %40 = vector.extract_strided_slice %9 {offsets = [0, 96], sizes = [32, 16], strides = [1, 1]} : vector<32x128xbf16> to vector<32x16xbf16>
    %c6 = arith.constant 6 : index
    %c0_33 = arith.constant 0 : index
    %c0_34 = arith.constant 0 : index
    %41 = vector.load %arg2[%c6, %c0_33, %c0_34] : memref<8x16x16xbf16, #tpu.memory_space<vmem>>, vector<1x16x16xbf16>
    %42 = vector.shape_cast %41 : vector<1x16x16xbf16> to vector<16x16xbf16>
    %cst_35 = arith.constant dense<0.000000e+00> : vector<32x16xf32>
    %43 = tpu.matmul %40, %42, %cst_35 {dimension_numbers = #tpu.dot_dimension_numbers<[1], [0], [0], [1], [0, 0, 1, 1], [], []>} : vector<32x16xbf16>, vector<16x16xbf16>, vector<32x16xf32> -> vector<32x16xf32>
    %c0_36 = arith.constant 0 : index
    %c96 = arith.constant 96 : index
    %44 = vector.load %arg9[%c0_36, %c96] : memref<32x128xf32, #tpu.memory_space<vmem>>, vector<32x16xf32>
    tpu.vector_store %arg9[%c0_36, %c96], %43 {strides = array<i32>} : memref<32x128xf32, #tpu.memory_space<vmem>>, vector<32x16xf32>,
    %45 = vector.extract_strided_slice %9 {offsets = [0, 112], sizes = [32, 16], strides = [1, 1]} : vector<32x128xbf16> to vector<32x16xbf16>
    %c7 = arith.constant 7 : index
    %c0_37 = arith.constant 0 : index
    %c0_38 = arith.constant 0 : index
    %46 = vector.load %arg2[%c7, %c0_37, %c0_38] : memref<8x16x16xbf16, #tpu.memory_space<vmem>>, vector<1x16x16xbf16>
    %47 = vector.shape_cast %46 : vector<1x16x16xbf16> to vector<16x16xbf16>
    %cst_39 = arith.constant dense<0.000000e+00> : vector<32x16xf32>
    %48 = tpu.matmul %45, %47, %cst_39 {dimension_numbers = #tpu.dot_dimension_numbers<[1], [0], [0], [1], [0, 0, 1, 1], [], []>} : vector<32x16xbf16>, vector<16x16xbf16>, vector<32x16xf32> -> vector<32x16xf32>
    %c0_40 = arith.constant 0 : index
    %c112 = arith.constant 112 : index
    %49 = vector.load %arg9[%c0_40, %c112] : memref<32x128xf32, #tpu.memory_space<vmem>>, vector<32x16xf32>
    tpu.vector_store %arg9[%c0_40, %c112], %48 {strides = array<i32>} : memref<32x128xf32, #tpu.memory_space<vmem>>, vector<32x16xf32>,
    %c0_41 = arith.constant 0 : index
    %c0_42 = arith.constant 0 : index
    %50 = vector.load %arg9[%c0_41, %c0_42] : memref<32x128xf32, #tpu.memory_space<vmem>>, vector<32x128xf32>
    %cst_43 = arith.constant 0.000000e+00 : f32
    %51 = vector.broadcast %cst_43 : f32 to vector<32x128xf32>
    %52 = arith.maximumf %50, %51 : vector<32x128xf32>
    %c0_44 = arith.constant 0 : index
    %c0_45 = arith.constant 0 : index
    %c0_46 = arith.constant 0 : index
    %53 = vector.load %arg5[%c0_44, %c0_45, %c0_46] : memref<2x32x1xf32, #tpu.memory_space<vmem>>, vector<1x32x1xf32>
    %54 = vector.shape_cast %53 : vector<1x32x1xf32> to vector<32x1xf32>
    %55 = vector.broadcast %54 : vector<32x1xf32> to vector<32x128xf32>
    %56 = arith.mulf %0, %55 : vector<32x128xf32>
    %c0_47 = arith.constant 0 : index
    %c0_48 = arith.constant 0 : index
    %c0_49 = arith.constant 0 : index
    %57 = vector.load %arg6[%c0_47, %c0_48, %c0_49] : memref<2x32x1xf32, #tpu.memory_space<vmem>>, vector<1x32x1xf32>
    %58 = vector.shape_cast %57 : vector<1x32x1xf32> to vector<32x1xf32>
    %59 = vector.broadcast %58 : vector<32x1xf32> to vector<32x128xf32>
    %60 = arith.mulf %52, %59 : vector<32x128xf32>
    %61 = arith.addf %56, %60 : vector<32x128xf32>
    %cst_50 = arith.constant dense<0.000000e+00> : vector<128xf32>
    %62 = vector.multi_reduction <add>, %61, %cst_50 [0] : vector<32x128xf32> to vector<128xf32>
    %63 = vector.shape_cast %62 : vector<128xf32> to vector<1x128xf32>
    %c0_51 = arith.constant 0 : index
    %64 = memref.load %arg7[%c0_51] : memref<2xf32, #tpu.memory_space<smem>>
    %65 = vector.broadcast %64 : f32 to vector<1x128xf32>
    %66 = arith.addf %63, %65 : vector<1x128xf32>
    %67 = arith.negf %66 : vector<1x128xf32>
    %68 = math.exp %67 : vector<1x128xf32>
    %cst_52 = arith.constant 1.000000e+00 : f32
    %69 = vector.broadcast %cst_52 : f32 to vector<1x128xf32>
    %70 = arith.addf %69, %68 : vector<1x128xf32>
    %71 = arith.divf %69, %70 : vector<1x128xf32>
    %72 = arith.subf %0, %52 : vector<32x128xf32>
    %73 = vector.broadcast %71 : vector<1x128xf32> to vector<32x128xf32>
    %74 = arith.mulf %73, %72 : vector<32x128xf32>
    %75 = arith.addf %52, %74 : vector<32x128xf32>
    %c1_53 = arith.constant 1 : index
    %c0_54 = arith.constant 0 : index
    %c0_55 = arith.constant 0 : index
    %76 = vector.load %arg3[%c1_53, %c0_54, %c0_55] : memref<2x32x32xbf16, #tpu.memory_space<vmem>>, vector<1x32x32xbf16>
    %77 = vector.shape_cast %76 : vector<1x32x32xbf16> to vector<32x32xbf16>
    %78 = arith.truncf %75 : vector<32x128xf32> to vector<32x128xbf16>
    %cst_56 = arith.constant dense<0.000000e+00> : vector<32x128xf32>
    %79 = tpu.matmul %77, %78, %cst_56 {dimension_numbers = #tpu.dot_dimension_numbers<[1], [0], [0], [1], [0, 0, 1, 1], [], []>} : vector<32x32xbf16>, vector<32x128xbf16>, vector<32x128xf32> -> vector<32x128xf32>
    %c1_57 = arith.constant 1 : index
    %c0_58 = arith.constant 0 : index
    %c0_59 = arith.constant 0 : index
    %80 = vector.load %arg4[%c1_57, %c0_58, %c0_59] : memref<2x32x1xf32, #tpu.memory_space<vmem>>, vector<1x32x1xf32>
    %81 = vector.shape_cast %80 : vector<1x32x1xf32> to vector<32x1xf32>
    %82 = vector.broadcast %81 : vector<32x1xf32> to vector<32x128xf32>
    %83 = arith.addf %79, %82 : vector<32x128xf32>
    %84 = arith.truncf %83 : vector<32x128xf32> to vector<32x128xbf16>
    %85 = vector.extract_strided_slice %84 {offsets = [0, 0], sizes = [32, 16], strides = [1, 1]} : vector<32x128xbf16> to vector<32x16xbf16>
    %c0_60 = arith.constant 0 : index
    %c0_61 = arith.constant 0 : index
    %c0_62 = arith.constant 0 : index
    %86 = vector.load %arg2[%c0_60, %c0_61, %c0_62] : memref<8x16x16xbf16, #tpu.memory_space<vmem>>, vector<1x16x16xbf16>
    %87 = vector.shape_cast %86 : vector<1x16x16xbf16> to vector<16x16xbf16>
    %cst_63 = arith.constant dense<0.000000e+00> : vector<32x16xf32>
    %88 = tpu.matmul %85, %87, %cst_63 {dimension_numbers = #tpu.dot_dimension_numbers<[1], [0], [0], [1], [0, 0, 1, 1], [], []>} : vector<32x16xbf16>, vector<16x16xbf16>, vector<32x16xf32> -> vector<32x16xf32>
    %c0_64 = arith.constant 0 : index
    %c0_65 = arith.constant 0 : index
    %89 = vector.load %arg9[%c0_64, %c0_65] : memref<32x128xf32, #tpu.memory_space<vmem>>, vector<32x16xf32>
    tpu.vector_store %arg9[%c0_64, %c0_65], %88 {strides = array<i32>} : memref<32x128xf32, #tpu.memory_space<vmem>>, vector<32x16xf32>,
    %90 = vector.extract_strided_slice %84 {offsets = [0, 16], sizes = [32, 16], strides = [1, 1]} : vector<32x128xbf16> to vector<32x16xbf16>
    %c1_66 = arith.constant 1 : index
    %c0_67 = arith.constant 0 : index
    %c0_68 = arith.constant 0 : index
    %91 = vector.load %arg2[%c1_66, %c0_67, %c0_68] : memref<8x16x16xbf16, #tpu.memory_space<vmem>>, vector<1x16x16xbf16>
    %92 = vector.shape_cast %91 : vector<1x16x16xbf16> to vector<16x16xbf16>
    %cst_69 = arith.constant dense<0.000000e+00> : vector<32x16xf32>
    %93 = tpu.matmul %90, %92, %cst_69 {dimension_numbers = #tpu.dot_dimension_numbers<[1], [0], [0], [1], [0, 0, 1, 1], [], []>} : vector<32x16xbf16>, vector<16x16xbf16>, vector<32x16xf32> -> vector<32x16xf32>
    %c0_70 = arith.constant 0 : index
    %c16_71 = arith.constant 16 : index
    %94 = vector.load %arg9[%c0_70, %c16_71] : memref<32x128xf32, #tpu.memory_space<vmem>>, vector<32x16xf32>
    tpu.vector_store %arg9[%c0_70, %c16_71], %93 {strides = array<i32>} : memref<32x128xf32, #tpu.memory_space<vmem>>, vector<32x16xf32>,
    %95 = vector.extract_strided_slice %84 {offsets = [0, 32], sizes = [32, 16], strides = [1, 1]} : vector<32x128xbf16> to vector<32x16xbf16>
    %c2_72 = arith.constant 2 : index
    %c0_73 = arith.constant 0 : index
    %c0_74 = arith.constant 0 : index
    %96 = vector.load %arg2[%c2_72, %c0_73, %c0_74] : memref<8x16x16xbf16, #tpu.memory_space<vmem>>, vector<1x16x16xbf16>
    %97 = vector.shape_cast %96 : vector<1x16x16xbf16> to vector<16x16xbf16>
    %cst_75 = arith.constant dense<0.000000e+00> : vector<32x16xf32>
    %98 = tpu.matmul %95, %97, %cst_75 {dimension_numbers = #tpu.dot_dimension_numbers<[1], [0], [0], [1], [0, 0, 1, 1], [], []>} : vector<32x16xbf16>, vector<16x16xbf16>, vector<32x16xf32> -> vector<32x16xf32>
    %c0_76 = arith.constant 0 : index
    %c32_77 = arith.constant 32 : index
    %99 = vector.load %arg9[%c0_76, %c32_77] : memref<32x128xf32, #tpu.memory_space<vmem>>, vector<32x16xf32>
    tpu.vector_store %arg9[%c0_76, %c32_77], %98 {strides = array<i32>} : memref<32x128xf32, #tpu.memory_space<vmem>>, vector<32x16xf32>,
    %100 = vector.extract_strided_slice %84 {offsets = [0, 48], sizes = [32, 16], strides = [1, 1]} : vector<32x128xbf16> to vector<32x16xbf16>
    %c3_78 = arith.constant 3 : index
    %c0_79 = arith.constant 0 : index
    %c0_80 = arith.constant 0 : index
    %101 = vector.load %arg2[%c3_78, %c0_79, %c0_80] : memref<8x16x16xbf16, #tpu.memory_space<vmem>>, vector<1x16x16xbf16>
    %102 = vector.shape_cast %101 : vector<1x16x16xbf16> to vector<16x16xbf16>
    %cst_81 = arith.constant dense<0.000000e+00> : vector<32x16xf32>
    %103 = tpu.matmul %100, %102, %cst_81 {dimension_numbers = #tpu.dot_dimension_numbers<[1], [0], [0], [1], [0, 0, 1, 1], [], []>} : vector<32x16xbf16>, vector<16x16xbf16>, vector<32x16xf32> -> vector<32x16xf32>
    %c0_82 = arith.constant 0 : index
    %c48_83 = arith.constant 48 : index
    %104 = vector.load %arg9[%c0_82, %c48_83] : memref<32x128xf32, #tpu.memory_space<vmem>>, vector<32x16xf32>
    tpu.vector_store %arg9[%c0_82, %c48_83], %103 {strides = array<i32>} : memref<32x128xf32, #tpu.memory_space<vmem>>, vector<32x16xf32>,
    %105 = vector.extract_strided_slice %84 {offsets = [0, 64], sizes = [32, 16], strides = [1, 1]} : vector<32x128xbf16> to vector<32x16xbf16>
    %c4_84 = arith.constant 4 : index
    %c0_85 = arith.constant 0 : index
    %c0_86 = arith.constant 0 : index
    %106 = vector.load %arg2[%c4_84, %c0_85, %c0_86] : memref<8x16x16xbf16, #tpu.memory_space<vmem>>, vector<1x16x16xbf16>
    %107 = vector.shape_cast %106 : vector<1x16x16xbf16> to vector<16x16xbf16>
    %cst_87 = arith.constant dense<0.000000e+00> : vector<32x16xf32>
    %108 = tpu.matmul %105, %107, %cst_87 {dimension_numbers = #tpu.dot_dimension_numbers<[1], [0], [0], [1], [0, 0, 1, 1], [], []>} : vector<32x16xbf16>, vector<16x16xbf16>, vector<32x16xf32> -> vector<32x16xf32>
    %c0_88 = arith.constant 0 : index
    %c64_89 = arith.constant 64 : index
    %109 = vector.load %arg9[%c0_88, %c64_89] : memref<32x128xf32, #tpu.memory_space<vmem>>, vector<32x16xf32>
    tpu.vector_store %arg9[%c0_88, %c64_89], %108 {strides = array<i32>} : memref<32x128xf32, #tpu.memory_space<vmem>>, vector<32x16xf32>,
    %110 = vector.extract_strided_slice %84 {offsets = [0, 80], sizes = [32, 16], strides = [1, 1]} : vector<32x128xbf16> to vector<32x16xbf16>
    %c5_90 = arith.constant 5 : index
    %c0_91 = arith.constant 0 : index
    %c0_92 = arith.constant 0 : index
    %111 = vector.load %arg2[%c5_90, %c0_91, %c0_92] : memref<8x16x16xbf16, #tpu.memory_space<vmem>>, vector<1x16x16xbf16>
    %112 = vector.shape_cast %111 : vector<1x16x16xbf16> to vector<16x16xbf16>
    %cst_93 = arith.constant dense<0.000000e+00> : vector<32x16xf32>
    %113 = tpu.matmul %110, %112, %cst_93 {dimension_numbers = #tpu.dot_dimension_numbers<[1], [0], [0], [1], [0, 0, 1, 1], [], []>} : vector<32x16xbf16>, vector<16x16xbf16>, vector<32x16xf32> -> vector<32x16xf32>
    %c0_94 = arith.constant 0 : index
    %c80_95 = arith.constant 80 : index
    %114 = vector.load %arg9[%c0_94, %c80_95] : memref<32x128xf32, #tpu.memory_space<vmem>>, vector<32x16xf32>
    tpu.vector_store %arg9[%c0_94, %c80_95], %113 {strides = array<i32>} : memref<32x128xf32, #tpu.memory_space<vmem>>, vector<32x16xf32>,
    %115 = vector.extract_strided_slice %84 {offsets = [0, 96], sizes = [32, 16], strides = [1, 1]} : vector<32x128xbf16> to vector<32x16xbf16>
    %c6_96 = arith.constant 6 : index
    %c0_97 = arith.constant 0 : index
    %c0_98 = arith.constant 0 : index
    %116 = vector.load %arg2[%c6_96, %c0_97, %c0_98] : memref<8x16x16xbf16, #tpu.memory_space<vmem>>, vector<1x16x16xbf16>
    %117 = vector.shape_cast %116 : vector<1x16x16xbf16> to vector<16x16xbf16>
    %cst_99 = arith.constant dense<0.000000e+00> : vector<32x16xf32>
    %118 = tpu.matmul %115, %117, %cst_99 {dimension_numbers = #tpu.dot_dimension_numbers<[1], [0], [0], [1], [0, 0, 1, 1], [], []>} : vector<32x16xbf16>, vector<16x16xbf16>, vector<32x16xf32> -> vector<32x16xf32>
    %c0_100 = arith.constant 0 : index
    %c96_101 = arith.constant 96 : index
    %119 = vector.load %arg9[%c0_100, %c96_101] : memref<32x128xf32, #tpu.memory_space<vmem>>, vector<32x16xf32>
    tpu.vector_store %arg9[%c0_100, %c96_101], %118 {strides = array<i32>} : memref<32x128xf32, #tpu.memory_space<vmem>>, vector<32x16xf32>,
    %120 = vector.extract_strided_slice %84 {offsets = [0, 112], sizes = [32, 16], strides = [1, 1]} : vector<32x128xbf16> to vector<32x16xbf16>
    %c7_102 = arith.constant 7 : index
    %c0_103 = arith.constant 0 : index
    %c0_104 = arith.constant 0 : index
    %121 = vector.load %arg2[%c7_102, %c0_103, %c0_104] : memref<8x16x16xbf16, #tpu.memory_space<vmem>>, vector<1x16x16xbf16>
    %122 = vector.shape_cast %121 : vector<1x16x16xbf16> to vector<16x16xbf16>
    %cst_105 = arith.constant dense<0.000000e+00> : vector<32x16xf32>
    %123 = tpu.matmul %120, %122, %cst_105 {dimension_numbers = #tpu.dot_dimension_numbers<[1], [0], [0], [1], [0, 0, 1, 1], [], []>} : vector<32x16xbf16>, vector<16x16xbf16>, vector<32x16xf32> -> vector<32x16xf32>
    %c0_106 = arith.constant 0 : index
    %c112_107 = arith.constant 112 : index
    %124 = vector.load %arg9[%c0_106, %c112_107] : memref<32x128xf32, #tpu.memory_space<vmem>>, vector<32x16xf32>
    tpu.vector_store %arg9[%c0_106, %c112_107], %123 {strides = array<i32>} : memref<32x128xf32, #tpu.memory_space<vmem>>, vector<32x16xf32>,
    %c0_108 = arith.constant 0 : index
    %c0_109 = arith.constant 0 : index
    %125 = vector.load %arg9[%c0_108, %c0_109] : memref<32x128xf32, #tpu.memory_space<vmem>>, vector<32x128xf32>
    %cst_110 = arith.constant 0.000000e+00 : f32
    %126 = vector.broadcast %cst_110 : f32 to vector<32x128xf32>
    %127 = arith.maximumf %125, %126 : vector<32x128xf32>
    %c1_111 = arith.constant 1 : index
    %c0_112 = arith.constant 0 : index
    %c0_113 = arith.constant 0 : index
    %128 = vector.load %arg5[%c1_111, %c0_112, %c0_113] : memref<2x32x1xf32, #tpu.memory_space<vmem>>, vector<1x32x1xf32>
    %129 = vector.shape_cast %128 : vector<1x32x1xf32> to vector<32x1xf32>
    %130 = vector.broadcast %129 : vector<32x1xf32> to vector<32x128xf32>
    %131 = arith.mulf %75, %130 : vector<32x128xf32>
    %c1_114 = arith.constant 1 : index
    %c0_115 = arith.constant 0 : index
    %c0_116 = arith.constant 0 : index
    %132 = vector.load %arg6[%c1_114, %c0_115, %c0_116] : memref<2x32x1xf32, #tpu.memory_space<vmem>>, vector<1x32x1xf32>
    %133 = vector.shape_cast %132 : vector<1x32x1xf32> to vector<32x1xf32>
    %134 = vector.broadcast %133 : vector<32x1xf32> to vector<32x128xf32>
    %135 = arith.mulf %127, %134 : vector<32x128xf32>
    %136 = arith.addf %131, %135 : vector<32x128xf32>
    %cst_117 = arith.constant dense<0.000000e+00> : vector<128xf32>
    %137 = vector.multi_reduction <add>, %136, %cst_117 [0] : vector<32x128xf32> to vector<128xf32>
    %138 = vector.shape_cast %137 : vector<128xf32> to vector<1x128xf32>
    %c1_118 = arith.constant 1 : index
    %139 = memref.load %arg7[%c1_118] : memref<2xf32, #tpu.memory_space<smem>>
    %140 = vector.broadcast %139 : f32 to vector<1x128xf32>
    %141 = arith.addf %138, %140 : vector<1x128xf32>
    %142 = arith.negf %141 : vector<1x128xf32>
    %143 = math.exp %142 : vector<1x128xf32>
    %cst_119 = arith.constant 1.000000e+00 : f32
    %144 = vector.broadcast %cst_119 : f32 to vector<1x128xf32>
    %145 = arith.addf %144, %143 : vector<1x128xf32>
    %146 = arith.divf %144, %145 : vector<1x128xf32>
    %147 = arith.subf %75, %127 : vector<32x128xf32>
    %148 = vector.broadcast %146 : vector<1x128xf32> to vector<32x128xf32>
    %149 = arith.mulf %148, %147 : vector<32x128xf32>
    %150 = arith.addf %127, %149 : vector<32x128xf32>
    %c0_120 = arith.constant 0 : index
    %c0_121 = arith.constant 0 : index
    %151 = vector.load %arg8[%c0_120, %c0_121] : memref<32x128xf32, #tpu.memory_space<vmem>>, vector<32x128xf32>
    tpu.vector_store %arg8[%c0_120, %c0_121], %150 {strides = array<i32>} : memref<32x128xf32, #tpu.memory_space<vmem>>, vector<32x128xf32>,
    return
  }
  func.func @transform_0(%arg0: i32) -> (i32, i32) {
    %c0_i32 = arith.constant 0 : i32
    %c0_i32_0 = arith.constant 0 : i32
    return %c0_i32, %arg0 : i32, i32
  }
  func.func @transform_1(%arg0: i32) -> (i32, i32, i32) {
    %c0_i32 = arith.constant 0 : i32
    %c0_i32_0 = arith.constant 0 : i32
    %c0_i32_1 = arith.constant 0 : i32
    return %arg0, %c0_i32, %c0_i32_0 : i32, i32, i32
  }
  func.func @transform_2(%arg0: i32) -> (i32, i32, i32) {
    %c0_i32 = arith.constant 0 : i32
    %c0_i32_0 = arith.constant 0 : i32
    %c0_i32_1 = arith.constant 0 : i32
    %c0_i32_2 = arith.constant 0 : i32
    return %c0_i32, %c0_i32_0, %c0_i32_1 : i32, i32, i32
  }
  func.func @transform_3(%arg0: i32) -> (i32, i32, i32) {
    %c0_i32 = arith.constant 0 : i32
    %c0_i32_0 = arith.constant 0 : i32
    %c0_i32_1 = arith.constant 0 : i32
    %c0_i32_2 = arith.constant 0 : i32
    return %c0_i32, %c0_i32_0, %c0_i32_1 : i32, i32, i32
  }
  func.func @transform_4(%arg0: i32) -> (i32, i32, i32) {
    %c0_i32 = arith.constant 0 : i32
    %c0_i32_0 = arith.constant 0 : i32
    %c0_i32_1 = arith.constant 0 : i32
    %c0_i32_2 = arith.constant 0 : i32
    return %c0_i32, %c0_i32_0, %c0_i32_1 : i32, i32, i32
  }
  func.func @transform_5(%arg0: i32) -> (i32, i32, i32) {
    %c0_i32 = arith.constant 0 : i32
    %c0_i32_0 = arith.constant 0 : i32
    %c0_i32_1 = arith.constant 0 : i32
    %c0_i32_2 = arith.constant 0 : i32
    return %c0_i32, %c0_i32_0, %c0_i32_1 : i32, i32, i32
  }
  func.func @transform_6(%arg0: i32) -> i32 {
    %c0_i32 = arith.constant 0 : i32
    %c0_i32_0 = arith.constant 0 : i32
    return %c0_i32 : i32
  }
  func.func @transform_7(%arg0: i32) -> (i32, i32) {
    %c0_i32 = arith.constant 0 : i32
    %c0_i32_0 = arith.constant 0 : i32
    return %c0_i32, %arg0 : i32, i32
  }
}

</mosaic_0001>

<bundles_post_ra>
// kernel: gconv_forward.1
= control target key start
LH: loop header
LB: loop body
LE: loop exit
PB: predicated region body
PF: predicated region fallthrough
CT: control target
= control target key end

     0   :  { %12 = vsyncpa [#allocation5], 0  ;;  %s2723_s24 = smov 0   ;;  %s2725_s25 = smov 0   ;;  %s3157_s0 = inlined_call_operand.vmem [shape: f32[32,256], index: 0, kind: input, shape index: {}]   ;;  %s3158_s1 = inlined_call_operand.vmem [shape: bf16[16,16,16], index: 1, kind: input, shape index: {}]   ;;  %s3159_s2 = inlined_call_operand.vmem [shape: bf16[2,32,32], index: 2, kind: input, shape index: {}]   ;;  %s3160_s3 = inlined_call_operand.vmem [shape: f32[2,32,1], index: 3, kind: input, shape index: {}]   ;;  %s3161_s4 = inlined_call_operand.vmem [shape: f32[2,32,1], index: 4, kind: input, shape index: {}]   ;;  %s3162_s5 = inlined_call_operand.vmem [shape: f32[2,32,1], index: 5, kind: input, shape index: {}]   ;;  %s3163_s6 = inlined_call_operand.vmem [shape: f32[2], index: 6, kind: input, shape index: {}]   ;;  %s3164_s7 = inlined_call_operand.vmem [shape: f32[32,256], index: 7, kind: output, shape index: {}]  }
   0x1   :  { %s2727_s26 = smov 0  }
   0x2 LB: > { %s2739_s27 = sadd.s32 4294967295, %s2672_s26   ;;  %s2742_s28 = sadd.s32 1, %s2672_s26   ;;  %s2672_s26 = sphi %s2727_s26, %s3174_s26   ;;  %s2668_s25 = sphi %s2725_s25, %s3173_s25   ;;  %s2664_s24 = sphi %s2723_s24, %s3172_s24  }
   0x3   : > { %s22_s29 = ssub.s32 %s2672_s26, %s2742_s28  ;;  %s25_s30 = sadd.s32 1, %s2668_s25 }
   0x4   : > { %p23_p0 = scmp.eq.s32.totalorder %s22_s29, 0  ;;  %p32_p1 = scmp.ne.s32.totalorder %s2668_s25, %s2664_s24 }
   0x5   : > { %p33_p2 = scmp.eq.s32.totalorder %s2672_s26, 0  ;;  %p193_p3 = scmp.eq.s32.totalorder %s2739_s27, 1 }
   0x6   : > { %s2752_s8 = scalar_select %p23_p0, %s2668_s25, %s25_s30  }
   0x7   : > { %p2754_p4 = por %p33_p2, %p32_p1  ;;  %p2758_p5 = por %p193_p3, %p32_p1 }
   0x8   : > { %p2270_p6 = scmp.ge.s32.totalorder %s2672_s26, 1  ;;  %p206_p7 = scmp.lt.s32.totalorder %s2672_s26, 3 }
   0x9   : > { %s3168_s10 = scalar_select %p2758_p5, 1, 0 }
   0xa   : > { %p2566_p8 = scmp.eq.s32.totalorder %s2739_s27, 0  ;;  %p2765_p9 = pnand %p2270_p6, %p206_p7 }
   0xb   : > { %s231_s14 = sshll.u32 %s3163_s6, 4  ;;  %s232_s14 = int_to_ptr.vmem [resolvable:$true] %s231_s14 }
   0xc   : > { %p2562_p10 = pneg %p2765_p9  ;;  %s2631_s15 = scalar_lea.vmem %s232_s14, 16 }
   0xd   : > { %p2632_p12 = scmp.ne.s32.totalorder %s232_s14, %s2631_s15  ;;  %p2639_p2 = scmp.lt.s32.totalorder %s232_s14, %s232_s14 }
   0xe   : > { %p2563_p11 = pnand %p2566_p8, %p2562_p10  ;;  %p2640_p3 = scmp.lt.s32.totalorder %s2631_s15, %s2631_s15 }
  0x10   : > { %p2633_p13 = pneg %p2563_p11  ;;  %p2641_p6 = por %p2640_p3, %p2639_p2 }
  0x12   : > { %p2634_p0 = pnand %p2633_p13, %p2632_p12 }
  0x14   : > { %p2635_p1 = pneg %p2634_p0 }
  0x16   : > { %p2642_p7 = pnand %p2641_p6, %p2635_p1 }
  0x18   : > { %2645 = shalt.err (!%p2642_p7)
}
  0x19   : > { %s2674_s16 = smov [#allocation4]   ;;  %p2272_p5 = scmp.ge.s32.totalorder %s2672_s26, 2 }
  0x1a   : > { %2565 = dma.vmem_to_smem (!%p2563_p11), %s232_s14, 16, %s2674_s16, [#allocation5]  }
  0x1b   : > { %238 = sbr.rel (%p2272_p5) target bundleno = 38 (0x26), region = 36 }
  0x20   : > { %241 = sbr.rel (!%p2754_p4) target bundleno = 38 (0x26), region = 40  ;;  %s243_s17 = sand.u32 (%p2754_p4), 1, %s2668_s25  }
  0x21   : > { %s2274_s18 = sshll.u32 (%p2754_p4), %s2672_s26, 3  ;;  %s2273_s19 = sshll.u32 (%p2754_p4), %s243_s17, 5 }
  0x22   : > { %s247_s22 = scalar_lea.vmem (%p2754_p4), %s3157_s0, %s2274_s18  ;;  %s245_s23 = scalar_lea.vmem (%p2754_p4), [#allocation3], %s2273_s19 }
  0x23   : > { %v282_v0 = vld [vmem:[%s247_s22] sm:$0xff] (%p2754_p4)  ;;  %v284_v1 = vld [vmem:[%s247_s22 + $0x10] sm:$0xff] (%p2754_p4) }
  0x24   : > { %v286_v2 = vld [vmem:[%s247_s22 + $0x20] sm:$0xff] (%p2754_p4)  ;;  %283 = vst [vmem:[%s245_s23] sm:$0xff] (%p2754_p4), %v282_v0  ;;  %285 = vst [vmem:[%s245_s23 + $0x8] sm:$0xff] (%p2754_p4), %v284_v1  ;;  %v288_v3 = vld [vmem:[%s247_s22 + $0x30] sm:$0xff] (%p2754_p4) }
  0x25   : > { %287 = vst [vmem:[%s245_s23 + $0x10] sm:$0xff] %v286_v2  ;;  %289 = vst [vmem:[%s245_s23 + $0x18] sm:$0xff] %v288_v3 }
  0x26 PF: > { %308 = sbr.rel (%p2765_p9) target bundleno = 1597 (0x63d), region = 82  ;;  %s311_s26 = sand.u32 (!%p2765_p9), 1, %s2664_s24  }
  0x27   : > { %s2787_s29 = sshll.u32 (!%p2765_p9), %s311_s26, 5 }
  0x28   : > { %s313_s30 = scalar_lea.vmem (!%p2765_p9), [#allocation3], %s2787_s29 }
  0x2b   : > { %2659 = dma.done.wait (%p2566_p8), [#allocation5], 16  }
  0x2c   : > { %2661 = vsyncadd (%p2566_p8), [#allocation5], 4294967280 }
  0x2d   : > { %321 = sfence }
  0x2e   : > { %v2794_v4 = vld [vmem:[%s313_s30 + $0x10] sm:$0xff]  ;;  %v2796_v5 = vld [vmem:[%s313_s30 + $0x18] sm:$0xff]  ;;  %v2798_v6 = vld [vmem:[%s313_s30] sm:$0xff]  ;;  %vm404_vm0 = vcmask 261120   ;;  %v2675_v9 = vmov 0   ;;  %s2827_s21 = sshll.u32 %s2739_s27, 3 }
  0x2f   : > { %v369_v7 = vpack.c.bf16 %v2796_v5, %v2794_v4  ;;  %v2802_v8 = vld [vmem:[%s313_s30 + $0x8] sm:$0xff]  ;;  %2601 = vset.pattern.permute.xlu0 %v2675_v9  ;;  %2602 = vset.pattern.permute.xlu1 %v2675_v9  ;;  %v2603_v11 = vld [vmem:[%s3159_s2] sm:$0xff]   ;;  %v372_v13 = vld [vmem:[%s3160_s3 + $0x10] sm:$0xff]  ;;  %p353_p4 = scmp.lt.s32.totalorder %s2827_s21, 15  ;;  %vm470_vm1 = vcmask 130048   ;;  %s2676_s27 = smov 112  }
  0x30   : > { %v368_v10 = vpack.c.bf16 %v2802_v8, %v2798_v6  ;;  %v370_v12 = vld [vmem:[%s3160_s3] sm:$0xff]  ;;  %2450 = vmatprep.mubr.msk.bf16.mxu0 %vm404_vm0, %v2603_v11  ;;  %386 = vperm.xlu1 %2602, %v372_v13   ;;  %v371_v14 = vld [vmem:[%s3160_s3 + $0x8] sm:$0xff]  ;;  %v373_v16 = vld [vmem:[%s3160_s3 + $0x18] sm:$0xff]  ;;  %s2677_s9 = smov 96   ;;  %s2678_s11 = smov 80   ;;  %vm616_vm2 = vcmask 261248  }
  0x31   : > { %2446 = vmatprep.subr.bf16.mxu0 %v369_v7  ;;  %376 = vperm.xlu0 %2601, %v370_v12   ;;  %v2604_v15 = vld [vmem:[%s3159_s2 + $0x8] sm:$0xff]   ;;  %s354_s22 = scalar_select %p353_p4, %s2827_s21, 15  ;;  %v1163_v37 = vld [vmem:[%s3161_s4] sm:$0xff]  ;;  %vm705_vm3 = vcmask 392448   ;;  %vm794_vm4 = vcmask 523648   ;;  %vm883_vm5 = vcmask 654848  }
  0x32   : > { %2447 = vmatpush3.bf16.msra.mxu0 %v369_v7  ;;  %s2679_s12 = smov 64   ;;  %s2680_s13 = smov 48   ;;  %v1164_v36 = vld [vmem:[%s3161_s4 + $0x8] sm:$0xff]  ;;  %vm972_vm6 = vcmask 786048   ;;  %vm1061_vm7 = vcmask 917248   ;;  %vm1150_vm8 = vcmask 1048448  }
  0x33   : > { %2448 = vmatprep.subr.bf16.mxu0 %v368_v10  ;;  %s2389_s23 = sshll.u32 %s354_s22, 3  ;;  %s2681_s14 = smov 32  }
  0x34   : > { %391 = vperm.xlu1 %2602, %v373_v16   ;;  %s2834_s24 = scalar_lea.vmem %s3158_s1, %s2389_s23  ;;  %s3165_s15 = smov 16  }
  0x35   : > { %381 = vperm.xlu0 %2601, %v371_v14   ;;  %v2605_v17 = vld [vmem:[%s2834_s24] sm:$0xff]   ;;  %v2606_v18 = vld [vmem:[%s2834_s24 + $0x8] sm:$0xff]   ;;  %v2607_v19 = vld [vmem:[%s2834_s24 + $0x10] sm:$0xff]   ;;  %s1232_s23 = sld [smem:[#allocation4]]  ;;  %s3170_s16 = smov 16  }
  0x36   : > { %2449 = vmatpush3.bf16.msra.mxu0 %v368_v10  ;;  %2454 = vmatprep.subr.bf16.mxu1 %v2605_v17  ;;  %v2609_v28 = vld [vmem:[%s2834_s24 + $0x20] sm:$0xff]   ;;  %v2608_v35 = vld [vmem:[%s2834_s24 + $0x18] sm:$0xff]   ;;  %v2610_v40 = vld [vmem:[%s2834_s24 + $0x28] sm:$0xff]   ;;  %s351_s17 = scalar_lea.vmem [#allocation6], %s2787_s29  ;;  %p3171_p5 = scmp.ne.s32.totalorder %s3168_s10, 0 }
  0x37   : > { %2455 = vmatpush3.bf16.msra.mxu1 %v2605_v17  ;;  %2466 = vmatprep.subr.bf16.mxu0 %v2607_v19  ;;  %v2611_v43 = vld [vmem:[%s2834_s24 + $0x30] sm:$0xff]   ;;  %v2612_v46 = vld [vmem:[%s2834_s24 + $0x38] sm:$0xff]   ;;  %s2142_s20 = scalar_lea.vmem (%p3171_p5), %s3164_s7, %s2827_s21 }
  0x38   : > { %2460 = vmatprep.subr.bf16.mxu1 %v2606_v18 }
  0x39   : > { %2451 = vmatmul.mubr.msk.bf16.vlgmr.msra.gmra.mxu0 %vm404_vm0, %v2604_v15 }
  0x3a   : > { %2467 = vmatpush3.bf16.msra.mxu0 %v2607_v19 }
  0x3b   : > { %2478 = vmatprep.subr.bf16.mxu0 %v2609_v28 }
  0xab   : > { %v387_v20 = vpop.permute.xlu1 %386 }
  0xac   : > { %v377_v21 = vpop.permute.xlu0 %376 }
  0xaf   : > { %v392_v24 = vpop.permute.xlu1 %391 }
  0xb0   : > { %v382_v29 = vpop.permute.xlu0 %381 }
  0xf9   : > { %v2452_v22 = vpop.f32.mrf.mxu0 }
  0xfa   : > { %v454_v26 = vadd.f32 %v2452_v22, %v387_v20 }
  0xfb   : > { %v445_v23 = vpop.f32.mrf.mxu0 }
  0xfc   : > { %v446_v31 = vadd.f32 %v445_v23, %v377_v21 }
  0xfd   : > { %v2453_v25 = vpop.f32.mrf.mxu0 }
  0xfe   : > { %v457_v27 = vadd.f32 %v2453_v25, %v392_v24 }
  0xff   : > { %v448_v30 = vpop.f32.mrf.mxu0 }
 0x100   : > { %v461_v32 = vpack.c.bf16 %v457_v27, %v454_v26  ;;  %v449_v33 = vadd.f32 %v448_v30, %v382_v29  ;;  %v1191_v26 = vld [vmem:[%s3162_s5] sm:$0xff]  ;;  %v1192_v29 = vld [vmem:[%s3162_s5 + $0x8] sm:$0xff]  ;;  %v1166_v30 = vld [vmem:[%s3161_s4 + $0x18] sm:$0xff] }
 0x102   : > { %v460_v34 = vpack.c.bf16 %v449_v33, %v446_v31  ;;  %537 = vrot.lane.b32.xlu1 %v461_v32, %s2676_s27  ;;  %v1193_v31 = vld [vmem:[%s3162_s5 + $0x10] sm:$0xff]  ;;  %v1194_v33 = vld [vmem:[%s3162_s5 + $0x18] sm:$0xff] }
 0x104   : > { %535 = vrot.lane.b32.xlu0 %v460_v34, %s2676_s27  ;;  %2456 = vmatprep.mubr.msk.bf16.mxu1 %vm470_vm1, %v460_v34 }
 0x105   : > { %2457 = vmatmul.mubr.msk.bf16.vlgmr.msra.gmra.mxu1 %vm470_vm1, %v461_v32 }
 0x106   : > { %626 = vrot.lane.b32.xlu1 %v461_v32, %s2677_s9  ;;  %2461 = vmatpush3.bf16.msra.mxu1 %v2606_v18 }
 0x107   : > { %2472 = vmatprep.subr.bf16.mxu1 %v2608_v35 }
 0x108   : > { %624 = vrot.lane.b32.xlu0 %v460_v34, %s2677_s9 }
 0x10a   : > { %715 = vrot.lane.b32.xlu1 %v461_v32, %s2678_s11 }
 0x10c   : > { %713 = vrot.lane.b32.xlu0 %v460_v34, %s2678_s11 }
 0x10e   : > { %804 = vrot.lane.b32.xlu1 %v461_v32, %s2679_s12 }
 0x110   : > { %802 = vrot.lane.b32.xlu0 %v460_v34, %s2679_s12 }
 0x112   : > { %893 = vrot.lane.b32.xlu1 %v461_v32, %s2680_s13 }
 0x114   : > { %891 = vrot.lane.b32.xlu0 %v460_v34, %s2680_s13 }
 0x116   : > { %982 = vrot.lane.b32.xlu1 %v461_v32, %s2681_s14 }
 0x118   : > { %980 = vrot.lane.b32.xlu0 %v460_v34, %s2681_s14 }
 0x11a   : > { %1071 = vrot.lane.b32.xlu1 %v461_v32, %s3165_s15  ;;  %v2329_v32 = vld [vmem:[%s3160_s3 + $0x20] sm:$0xff] }
 0x11c   : > { %1069 = vrot.lane.b32.xlu0 %v460_v34, %s3165_s15  ;;  %v2331_v34 = vld [vmem:[%s3160_s3 + $0x30] sm:$0xff] }
 0x11e   : > { %1174 = vperm.xlu1 %2602, %v1164_v36   ;;  %v2332_v36 = vld [vmem:[%s3160_s3 + $0x38] sm:$0xff] }
 0x120   : > { %1169 = vperm.xlu0 %2601, %v1163_v37  }
 0x174   : > { %v538_v38 = vpop.permute.xlu1 %537 }
 0x176   : > { %v536_v39 = vpop.permute.xlu0 %535 }
 0x177   : > { %2462 = vmatprep.mubr.msk.bf16.mxu1 %vm470_vm1, %v536_v39 }
 0x178   : > { %v627_v41 = vpop.permute.xlu1 %626  ;;  %2463 = vmatmul.mubr.msk.bf16.vlgmr.msra.gmra.mxu1 %vm470_vm1, %v538_v38 }
 0x179   : > { %2473 = vmatpush3.bf16.msra.mxu1 %v2608_v35  ;;  %v2330_v35 = vld [vmem:[%s3160_s3 + $0x28] sm:$0xff] }
 0x17a   : > { %v625_v42 = vpop.permute.xlu0 %624  ;;  %2484 = vmatprep.subr.bf16.mxu1 %v2610_v40 }
 0x17b   : > { %2468 = vmatprep.mubr.msk.bf16.mxu0 %vm470_vm1, %v625_v42 }
 0x17c   : > { %v716_v44 = vpop.permute.xlu1 %715  ;;  %2469 = vmatmul.mubr.msk.bf16.vlgmr.msra.gmra.mxu0 %vm470_vm1, %v627_v41 }
 0x17d   : > { %2479 = vmatpush3.bf16.msra.mxu0 %v2609_v28  ;;  %v1165_v28 = vld [vmem:[%s3161_s4 + $0x10] sm:$0xff] }
 0x17e   : > { %v714_v45 = vpop.permute.xlu0 %713  ;;  %2490 = vmatprep.subr.bf16.mxu0 %v2611_v43 }
 0x17f   : > { %2474 = vmatprep.mubr.msk.bf16.mxu1 %vm470_vm1, %v714_v45 }
 0x180   : > { %v805_v47 = vpop.permute.xlu1 %804  ;;  %2475 = vmatmul.mubr.msk.bf16.vlgmr.msra.gmra.mxu1 %vm470_vm1, %v716_v44 }
 0x181   : > { %2485 = vmatpush3.bf16.msra.mxu1 %v2610_v40 }
 0x182   : > { %v803_v48 = vpop.permute.xlu0 %802  ;;  %2496 = vmatprep.subr.bf16.mxu1 %v2612_v46 }
 0x183   : > { %2480 = vmatprep.mubr.msk.bf16.mxu0 %vm470_vm1, %v803_v48 }
 0x184   : > { %v894_v49 = vpop.permute.xlu1 %893  ;;  %2481 = vmatmul.mubr.msk.bf16.vlgmr.msra.gmra.mxu0 %vm470_vm1, %v805_v47 }
 0x185   : > { %2491 = vmatpush3.bf16.msra.mxu0 %v2611_v43 }
 0x186   : > { %v892_v50 = vpop.permute.xlu0 %891 }
 0x187   : > { %2486 = vmatprep.mubr.msk.bf16.mxu1 %vm470_vm1, %v892_v50 }
 0x188   : > { %2487 = vmatmul.mubr.msk.bf16.vlgmr.msra.gmra.mxu1 %vm470_vm1, %v894_v49  ;;  %v983_v51 = vpop.permute.xlu1 %982 }
 0x189   : > { %2497 = vmatpush3.bf16.msra.mxu1 %v2612_v46  ;;  %v2613_v46 = vld [vmem:[%s3159_s2 + $0x10] sm:$0xff]  }
 0x18a   : > { %v981_v52 = vpop.permute.xlu0 %980 }
 0x18b   : > { %2492 = vmatprep.mubr.msk.bf16.mxu0 %vm470_vm1, %v981_v52 }
 0x18c   : > { %2493 = vmatmul.mubr.msk.bf16.vlgmr.msra.gmra.mxu0 %vm470_vm1, %v983_v51  ;;  %v1072_v54 = vpop.permute.xlu1 %1071 }
 0x18d   : > { %2506 = vmatprep.mubr.msk.bf16.mxu0 %vm404_vm0, %v2613_v46 }
 0x18e   : > { %v1070_v53 = vpop.permute.xlu0 %1069 }
 0x18f   : > { %2498 = vmatprep.mubr.msk.bf16.mxu1 %vm470_vm1, %v1070_v53 }
 0x190   : > { %2499 = vmatmul.mubr.msk.bf16.vlgmr.msra.gmra.mxu1 %vm470_vm1, %v1072_v54 }
 0x199   : > { %v2944_v38 = vpop.permute.xlu1 %1174 }
 0x19b   : > { %v2942_v37 = vpop.permute.xlu0 %1169 }
 0x1c5   : > { %v2458_v55 = vpop.f32.mrf.mxu1 }
 0x1c6   : > { %528 = vst.msk [vmem:[#allocation2 + $0x10] sm:$0xff] %vm470_vm1, %v2458_v55 }
 0x1c7   : > { %v511_v56 = vpop.f32.mrf.mxu1 }
 0x1c8   : > { %526 = vst.msk [vmem:[#allocation2] sm:$0xff] %vm470_vm1, %v511_v56 }
 0x1c9   : > { %v2459_v57 = vpop.f32.mrf.mxu1 }
 0x1ca   : > { %529 = vst.msk [vmem:[#allocation2 + $0x18] sm:$0xff] %vm470_vm1, %v2459_v57 }
 0x1cb   : > { %v514_v58 = vpop.f32.mrf.mxu1 }
 0x1cc   : > { %527 = vst.msk [vmem:[#allocation2 + $0x8] sm:$0xff] %vm470_vm1, %v514_v58 }
 0x238   : > { %v2464_v59 = vpop.f32.mrf.mxu1 }
 0x239   : > { %608 = vrot.lane.b32.xlu0 %v2464_v59, %s3165_s15 }
 0x23a   : > { %v585_v60 = vpop.f32.mrf.mxu1 }
 0x23c   : > { %v2465_v61 = vpop.f32.mrf.mxu1  ;;  %v2470_v62 = vpop.f32.mrf.mxu0 }
 0x23d   : > { %697 = vrot.lane.b32.xlu1 %v2470_v62, %s2681_s14  ;;  %604 = vrot.lane.b32.xlu0 %v585_v60, %s3165_s15 }
 0x23e   : > { %v674_v63 = vpop.f32.mrf.mxu0  ;;  %v588_v0 = vpop.f32.mrf.mxu1 }
 0x240   : > { %v2471_v1 = vpop.f32.mrf.mxu0  ;;  %v2476_v2 = vpop.f32.mrf.mxu1 }
 0x241   : > { %693 = vrot.lane.b32.xlu0 %v674_v63, %s2681_s14  ;;  %606 = vrot.lane.b32.xlu1 %v588_v0, %s3165_s15 }
 0x242   : > { %v677_v3 = vpop.f32.mrf.mxu0  ;;  %v763_v7 = vpop.f32.mrf.mxu1 }
 0x244   : > { %v2482_v9 = vpop.f32.mrf.mxu0  ;;  %v2477_v10 = vpop.f32.mrf.mxu1 }
 0x245   : > { %610 = vrot.lane.b32.xlu0 %v2465_v61, %s3165_s15  ;;  %695 = vrot.lane.b32.xlu1 %v677_v3, %s2681_s14 }
 0x246   : > { %v852_v11 = vpop.f32.mrf.mxu0  ;;  %v766_v12 = vpop.f32.mrf.mxu1 }
 0x248   : > { %v2483_v13 = vpop.f32.mrf.mxu0  ;;  %v2488_v14 = vpop.f32.mrf.mxu1 }
 0x249   : > { %699 = vrot.lane.b32.xlu0 %v2471_v1, %s2681_s14  ;;  %786 = vrot.lane.b32.xlu1 %v2476_v2, %s2680_s13 }
 0x24a   : > { %v855_v15 = vpop.f32.mrf.mxu0  ;;  %v941_v16 = vpop.f32.mrf.mxu1 }
 0x24c   : > { %v2494_v17 = vpop.f32.mrf.mxu0  ;;  %v2489_v18 = vpop.f32.mrf.mxu1 }
 0x24d   : > { %871 = vrot.lane.b32.xlu0 %v852_v11, %s2679_s12  ;;  %875 = vrot.lane.b32.xlu1 %v2482_v9, %s2679_s12 }
 0x24e   : > { %v1030_v19 = vpop.f32.mrf.mxu0  ;;  %v944_v20 = vpop.f32.mrf.mxu1 }
 0x250   : > { %v2495_v21 = vpop.f32.mrf.mxu0  ;;  %v2500_v22 = vpop.f32.mrf.mxu1 }
 0x251   : > { %782 = vrot.lane.b32.xlu1 %v763_v7, %s2680_s13  ;;  %788 = vrot.lane.b32.xlu0 %v2477_v10, %s2680_s13 }
 0x252   : > { %v1033_v23 = vpop.f32.mrf.mxu0  ;;  %v1119_v24 = vpop.f32.mrf.mxu1 }
 0x254   : > { %v2501_v25 = vpop.f32.mrf.mxu1 }
 0x255   : > { %873 = vrot.lane.b32.xlu1 %v855_v15, %s2679_s12  ;;  %877 = vrot.lane.b32.xlu0 %v2483_v13, %s2679_s12 }
 0x256   : > { %v1122_v27 = vpop.f32.mrf.mxu1 }
 0x259   : > { %784 = vrot.lane.b32.xlu0 %v766_v12, %s2680_s13  ;;  %964 = vrot.lane.b32.xlu1 %v2488_v14, %s2678_s11 }
 0x25d   : > { %1053 = vrot.lane.b32.xlu1 %v2494_v17, %s2677_s9  ;;  %960 = vrot.lane.b32.xlu0 %v941_v16, %s2678_s11  ;;  %v1188_v17 = vmul.f32 %v2944_v38, %v2802_v8 }
 0x261   : > { %1049 = vrot.lane.b32.xlu0 %v1030_v19, %s2677_s9  ;;  %962 = vrot.lane.b32.xlu1 %v944_v20, %s2678_s11 }
 0x265   : > { %966 = vrot.lane.b32.xlu0 %v2489_v18, %s2678_s11  ;;  %1051 = vrot.lane.b32.xlu1 %v1033_v23, %s2677_s9 }
 0x269   : > { %1055 = vrot.lane.b32.xlu0 %v2495_v21, %s2677_s9  ;;  %1142 = vrot.lane.b32.xlu1 %v2500_v22, %s2676_s27  ;;  %v1187_v22 = vmul.f32 %v2942_v37, %v2798_v6 }
 0x26d   : > { %1138 = vrot.lane.b32.xlu0 %v1119_v24, %s2676_s27  ;;  %1144 = vrot.lane.b32.xlu1 %v2501_v25, %s2676_s27 }
 0x271   : > { %1197 = vperm.xlu0 %2601, %v1191_v26   ;;  %1140 = vrot.lane.b32.xlu1 %v1122_v27, %s2676_s27 }
 0x275   : > { %1179 = vperm.xlu0 %2601, %v1165_v28   ;;  %1202 = vperm.xlu1 %2602, %v1192_v29  }
 0x279   : > { %1184 = vperm.xlu0 %2601, %v1166_v30   ;;  %1207 = vperm.xlu1 %2602, %v1193_v31  }
 0x27d   : > { %1267 = vperm.xlu0 %2601, %v2329_v32   ;;  %1212 = vperm.xlu1 %2602, %v1194_v33  }
 0x281   : > { %1277 = vperm.xlu0 %2601, %v2331_v34   ;;  %1272 = vperm.xlu1 %2602, %v2330_v35  }
 0x285   : > { %1282 = vperm.xlu1 %2602, %v2332_v36  }
 0x2ab   : > { %v609_v39 = vpop.permute.xlu0 %608 }
 0x2ac   : > { %619 = vst.msk [vmem:[#allocation2 + $0x10] sm:$0xff] %vm616_vm2, %v609_v39 }
 0x2af   : > { %v698_v40 = vpop.permute.xlu1 %697  ;;  %v605_v41 = vpop.permute.xlu0 %604 }
 0x2b0   : > { %708 = vst.msk [vmem:[#allocation2 + $0x10] sm:$0xff] %vm705_vm3, %v698_v40 }
 0x2b1   : > { %617 = vst.msk [vmem:[#allocation2] sm:$0xff] %vm616_vm2, %v605_v41 }
 0x2b3   : > { %v694_v42 = vpop.permute.xlu0 %693  ;;  %v607_v43 = vpop.permute.xlu1 %606 }
 0x2b4   : > { %706 = vst.msk [vmem:[#allocation2] sm:$0xff] %vm705_vm3, %v694_v42  ;;  %v1233_v42 = vstv %s1232_s23 }
 0x2b5   : > { %618 = vst.msk [vmem:[#allocation2 + $0x8] sm:$0xff] %vm616_vm2, %v607_v43 }
 0x2b7   : > { %v611_v44 = vpop.permute.xlu0 %610  ;;  %v696_v45 = vpop.permute.xlu1 %695 }
 0x2b8   : > { %620 = vst.msk [vmem:[#allocation2 + $0x18] sm:$0xff] %vm616_vm2, %v611_v44 }
 0x2b9   : > { %707 = vst.msk [vmem:[#allocation2 + $0x8] sm:$0xff] %vm705_vm3, %v696_v45 }
 0x2bb   : > { %v700_v47 = vpop.permute.xlu0 %699  ;;  %v787_v48 = vpop.permute.xlu1 %786 }
 0x2bc   : > { %709 = vst.msk [vmem:[#allocation2 + $0x18] sm:$0xff] %vm705_vm3, %v700_v47 }
 0x2bd   : > { %797 = vst.msk [vmem:[#allocation2 + $0x10] sm:$0xff] %vm794_vm4, %v787_v48 }
 0x2bf   : > { %v872_v49 = vpop.permute.xlu0 %871  ;;  %v876_v50 = vpop.permute.xlu1 %875 }
 0x2c0   : > { %886 = vst.msk [vmem:[#allocation2 + $0x10] sm:$0xff] %vm883_vm5, %v876_v50 }
 0x2c3   : > { %v783_v51 = vpop.permute.xlu1 %782  ;;  %v789_v52 = vpop.permute.xlu0 %788 }
 0x2c4   : > { %795 = vst.msk [vmem:[#allocation2] sm:$0xff] %vm794_vm4, %v783_v51  ;;  %798 = vst.msk [vmem:[#allocation2 + $0x18] sm:$0xff] %vm794_vm4, %v789_v52 }
 0x2c5   : > { %884 = vst.msk [vmem:[#allocation2] sm:$0xff] %vm883_vm5, %v872_v49 }
 0x2c7   : > { %v874_v53 = vpop.permute.xlu1 %873  ;;  %v878_v54 = vpop.permute.xlu0 %877 }
 0x2c8   : > { %887 = vst.msk [vmem:[#allocation2 + $0x18] sm:$0xff] %vm883_vm5, %v878_v54 }
 0x2cb   : > { %v785_v55 = vpop.permute.xlu0 %784  ;;  %v965_v56 = vpop.permute.xlu1 %964 }
 0x2cc   : > { %796 = vst.msk [vmem:[#allocation2 + $0x8] sm:$0xff] %vm794_vm4, %v785_v55 }
 0x2cd   : > { %975 = vst.msk [vmem:[#allocation2 + $0x10] sm:$0xff] %vm972_vm6, %v965_v56 }
 0x2ce   : > { %885 = vst.msk [vmem:[#allocation2 + $0x8] sm:$0xff] %vm883_vm5, %v874_v53 }
 0x2cf   : > { %v1054_v57 = vpop.permute.xlu1 %1053  ;;  %v961_v58 = vpop.permute.xlu0 %960 }
 0x2d0   : > { %1064 = vst.msk [vmem:[#allocation2 + $0x10] sm:$0xff] %vm1061_vm7, %v1054_v57 }
 0x2d1   : > { %973 = vst.msk [vmem:[#allocation2] sm:$0xff] %vm972_vm6, %v961_v58 }
 0x2d3   : > { %v1050_v59 = vpop.permute.xlu0 %1049  ;;  %v963_v60 = vpop.permute.xlu1 %962 }
 0x2d4   : > { %1062 = vst.msk [vmem:[#allocation2] sm:$0xff] %vm1061_vm7, %v1050_v59 }
 0x2d5   : > { %974 = vst.msk [vmem:[#allocation2 + $0x8] sm:$0xff] %vm972_vm6, %v963_v60  ;;  %v2615_v60 = vld [vmem:[%s2834_s24] sm:$0xff]  }
 0x2d6   : > { %2510 = vmatprep.subr.bf16.mxu1 %v2615_v60 }
 0x2d7   : > { %v967_v61 = vpop.permute.xlu0 %966  ;;  %v1052_v62 = vpop.permute.xlu1 %1051  ;;  %2511 = vmatpush3.bf16.msra.mxu1 %v2615_v60 }
 0x2d8   : > { %976 = vst.msk [vmem:[#allocation2 + $0x18] sm:$0xff] %vm972_vm6, %v967_v61  ;;  %v2616_v61 = vld [vmem:[%s2834_s24 + $0x8] sm:$0xff]  }
 0x2d9   : > { %1063 = vst.msk [vmem:[#allocation2 + $0x8] sm:$0xff] %vm1061_vm7, %v1052_v62  ;;  %v2617_v62 = vld [vmem:[%s2834_s24 + $0x10] sm:$0xff]  }
 0x2da   : > { %2522 = vmatprep.subr.bf16.mxu1 %v2617_v62 }
 0x2db   : > { %v1056_v63 = vpop.permute.xlu0 %1055  ;;  %v1143_v0 = vpop.permute.xlu1 %1142 }
 0x2dc   : > { %1065 = vst.msk [vmem:[#allocation2 + $0x18] sm:$0xff] %vm1061_vm7, %v1056_v63 }
 0x2dd   : > { %1153 = vst.msk [vmem:[#allocation2 + $0x10] sm:$0xff] %vm1150_vm8, %v1143_v0 }
 0x2df   : > { %v1139_v1 = vpop.permute.xlu0 %1138  ;;  %v1145_v2 = vpop.permute.xlu1 %1144 }
 0x2e0   : > { %1151 = vst.msk [vmem:[#allocation2] sm:$0xff] %vm1150_vm8, %v1139_v1  ;;  %1154 = vst.msk [vmem:[#allocation2 + $0x18] sm:$0xff] %vm1150_vm8, %v1145_v2  ;;  %v2618_v2 = vld [vmem:[%s2834_s24 + $0x18] sm:$0xff]  }
 0x2e3   : > { %v1141_v3 = vpop.permute.xlu1 %1140 }
 0x2e4   : > { %1152 = vst.msk [vmem:[#allocation2 + $0x8] sm:$0xff] %vm1150_vm8, %v1141_v3  ;;  %v1157_v14 = vld [vmem:[#allocation2 + $0x10] sm:$0xff] }
 0x2e5   : > { %v1161_v19 = vmax.f32 %v1157_v14, 0.0 }
 0x2e7   : > { %v1155_v10 = vld [vmem:[#allocation2] sm:$0xff]  ;;  %v1158_v21 = vld [vmem:[#allocation2 + $0x18] sm:$0xff]  ;;  %v1243_v50 = vsub.f32 %v2794_v4, %v1161_v19 }
 0x2e8   : > { %v1159_v15 = vmax.f32 %v1155_v10, 0.0  ;;  %v1162_v29 = vmax.f32 %v1158_v21, 0.0 }
 0x2ea   : > { %v1241_v48 = vsub.f32 %v2798_v6, %v1159_v15  ;;  %v1244_v51 = vsub.f32 %v2796_v5, %v1162_v29 }
 0x2eb   : > { %v1156_v9 = vld [vmem:[#allocation2 + $0x8] sm:$0xff] }
 0x2ec   : > { %v1198_v7 = vpop.permute.xlu0 %1197  ;;  %v1160_v11 = vmax.f32 %v1156_v9, 0.0 }
 0x2ed   : > { %v1215_v18 = vmul.f32 %v1198_v7, %v1159_v15 }
 0x2ee   : > { %v1242_v49 = vsub.f32 %v2802_v8, %v1160_v11  ;;  %v2614_v8 = vld [vmem:[%s3159_s2 + $0x18] sm:$0xff]  }
 0x2ef   : > { %v1219_v27 = vadd.f32 %v1215_v18, %v1187_v22  ;;  %v2619_v18 = vld [vmem:[%s2834_s24 + $0x20] sm:$0xff]  }
 0x2f0   : > { %v1180_v12 = vpop.permute.xlu0 %1179  ;;  %v1203_v13 = vpop.permute.xlu1 %1202 }
 0x2f1   : > { %v1216_v16 = vmul.f32 %v1203_v13, %v1160_v11  ;;  %v1189_v23 = vmul.f32 %v1180_v12, %v2794_v4 }
 0x2f3   : > { %v1220_v24 = vadd.f32 %v1216_v16, %v1188_v17 }
 0x2f4   : > { %v1208_v20 = vpop.permute.xlu1 %1207  ;;  %v1185_v26 = vpop.permute.xlu0 %1184 }
 0x2f5   : > { %v1217_v25 = vmul.f32 %v1208_v20, %v1161_v19  ;;  %v1223_v31 = vadd.f32 %v1220_v24, %v1219_v27  ;;  %v1190_v32 = vmul.f32 %v1185_v26, %v2796_v5  ;;  %v2375_v20 = vld [vmem:[%s3161_s4 + $0x20] sm:$0xff]  ;;  %v2621_v26 = vld [vmem:[%s2834_s24 + $0x30] sm:$0xff]  }
 0x2f7   : > { %v1221_v28 = vadd.f32 %v1217_v25, %v1189_v23  ;;  %v2620_v23 = vld [vmem:[%s2834_s24 + $0x28] sm:$0xff]  }
 0x2f8   : > { %v1213_v30 = vpop.permute.xlu1 %1212  ;;  %v1268_v63 = vpop.permute.xlu0 %1267 }
 0x2f9   : > { %v1218_v33 = vmul.f32 %v1213_v30, %v1162_v29  ;;  %v1224_v34 = vadd.f32 %v1223_v31, %v1221_v28 }
 0x2fb   : > { %v1222_v35 = vadd.f32 %v1218_v33, %v1190_v32 }
 0x2fc   : > { %v1273_v0 = vpop.permute.xlu1 %1272  ;;  %v1278_v7 = vpop.permute.xlu0 %1277 }
 0x2fd   : > { %v1225_v36 = vadd.f32 %v1224_v34, %v1222_v35 }
 0x2ff   : > { %v1226_v38 = vrot.slane %v1225_v36, 4 }
 0x300   : > { %v1283_v9 = vpop.permute.xlu1 %1282 }
 0x301   : > { %v1227_v39 = vadd.f32 %v1226_v38, %v1225_v36 }
 0x303   : > { %v1228_v37 = vrot.slane %v1227_v39, 2 }
 0x305   : > { %v1229_v40 = vadd.f32 %v1228_v37, %v1227_v39 }
 0x307   : > { %v1230_v41 = vrot.slane %v1229_v40, 1 }
 0x309   : > { %v1231_v43 = vadd.f32 %v1230_v41, %v1229_v40 }
 0x30b   : > { %v1234_v44 = vadd.f32 %v1233_v42, %v1231_v43 }
 0x30d   : > { %v2324_v45 = vmul.f32 -1.442695, %v1234_v44 }
 0x30f   : > { %2623 = vpow2.f32 %v2324_v45 }
 0x31c   : > { %v2624_v46 = vpop.eup %2623 }
 0x31d   : > { %v1238_v47 = vadd.f32 1.0, %v2624_v46 }
 0x31f   : > { %2625 = vrcp.f32 %v1238_v47 }
 0x32c   : > { %v2626_v52 = vpop.eup %2625 }
 0x32d   : > { %v1247_v53 = vmul.f32 %v2626_v52, %v1243_v50  ;;  %v1248_v54 = vmul.f32 %v2626_v52, %v1244_v51  ;;  %v1245_v55 = vmul.f32 %v2626_v52, %v1241_v48  ;;  %v1246_v56 = vmul.f32 %v2626_v52, %v1242_v49 }
 0x32f   : > { %v2988_v57 = vadd.f32 %v1247_v53, %v1161_v19  ;;  %v2990_v58 = vadd.f32 %v1248_v54, %v1162_v29  ;;  %v2992_v59 = vadd.f32 %v1245_v55, %v1159_v15  ;;  %v2994_v6 = vadd.f32 %v1246_v56, %v1160_v11  ;;  %v2376_v19 = vld [vmem:[%s3161_s4 + $0x28] sm:$0xff]  ;;  %v2622_v29 = vld [vmem:[%s2834_s24 + $0x38] sm:$0xff]  }
 0x331   : > { %v1259_v4 = vpack.c.bf16 %v2990_v58, %v2988_v57  ;;  %v1258_v5 = vpack.c.bf16 %v2994_v6, %v2992_v59 }
 0x333   : > { %2502 = vmatprep.subr.bf16.mxu0 %v1259_v4 }
 0x334   : > { %2503 = vmatpush3.bf16.msra.mxu0 %v1259_v4 }
 0x335   : > { %2504 = vmatprep.subr.bf16.mxu0 %v1258_v5 }
 0x338   : > { %2505 = vmatpush3.bf16.msra.mxu0 %v1258_v5 }
 0x339   : > { %2516 = vmatprep.subr.bf16.mxu0 %v2616_v61 }
 0x33b   : > { %2507 = vmatmul.mubr.msk.bf16.vlgmr.msra.gmra.mxu0 %vm404_vm0, %v2614_v8 }
 0x33c   : > { %2517 = vmatpush3.bf16.msra.mxu0 %v2616_v61 }
 0x33d   : > { %2528 = vmatprep.subr.bf16.mxu0 %v2618_v2 }
 0x3fb   : > { %v2508_v1 = vpop.f32.mrf.mxu0 }
 0x3fc   : > { %v1344_v11 = vadd.f32 %v2508_v1, %v1278_v7 }
 0x3fd   : > { %v1335_v3 = vpop.f32.mrf.mxu0 }
 0x3fe   : > { %v1336_v14 = vadd.f32 %v1335_v3, %v1268_v63 }
 0x3ff   : > { %v2509_v10 = vpop.f32.mrf.mxu0 }
 0x400   : > { %v1347_v12 = vadd.f32 %v2509_v10, %v1283_v9  ;;  %v2379_v9 = vld [vmem:[%s3162_s5 + $0x20] sm:$0xff] }
 0x401   : > { %v1338_v13 = vpop.f32.mrf.mxu0 }
 0x402   : > { %v1351_v15 = vpack.c.bf16 %v1347_v12, %v1344_v11  ;;  %v1339_v16 = vadd.f32 %v1338_v13, %v1273_v0  ;;  %v2377_v11 = vld [vmem:[%s3161_s4 + $0x30] sm:$0xff]  ;;  %v2380_v12 = vld [vmem:[%s3162_s5 + $0x28] sm:$0xff]  ;;  %v2378_v13 = vld [vmem:[%s3161_s4 + $0x38] sm:$0xff] }
 0x404   : > { %v1350_v17 = vpack.c.bf16 %v1339_v16, %v1336_v14  ;;  %1425 = vrot.lane.b32.xlu1 %v1351_v15, %s2676_s27  ;;  %v2381_v14 = vld [vmem:[%s3162_s5 + $0x30] sm:$0xff] }
 0x406   : > { %1423 = vrot.lane.b32.xlu0 %v1350_v17, %s2676_s27  ;;  %2512 = vmatprep.mubr.msk.bf16.mxu1 %vm470_vm1, %v1350_v17 }
 0x407   : > { %2513 = vmatmul.mubr.msk.bf16.vlgmr.msra.gmra.mxu1 %vm470_vm1, %v1351_v15 }
 0x408   : > { %1512 = vrot.lane.b32.xlu1 %v1351_v15, %s2677_s9  ;;  %2523 = vmatpush3.bf16.msra.mxu1 %v2617_v62 }
 0x409   : > { %2534 = vmatprep.subr.bf16.mxu1 %v2619_v18 }
 0x40a   : > { %1510 = vrot.lane.b32.xlu0 %v1350_v17, %s2677_s9 }
 0x40c   : > { %1599 = vrot.lane.b32.xlu1 %v1351_v15, %s2678_s11 }
 0x40e   : > { %1597 = vrot.lane.b32.xlu0 %v1350_v17, %s2678_s11 }
 0x410   : > { %1686 = vrot.lane.b32.xlu1 %v1351_v15, %s2679_s12 }
 0x412   : > { %1684 = vrot.lane.b32.xlu0 %v1350_v17, %s2679_s12 }
 0x414   : > { %1773 = vrot.lane.b32.xlu1 %v1351_v15, %s2680_s13 }
 0x416   : > { %1771 = vrot.lane.b32.xlu0 %v1350_v17, %s2680_s13 }
 0x418   : > { %1860 = vrot.lane.b32.xlu1 %v1351_v15, %s2681_s14 }
 0x41a   : > { %1858 = vrot.lane.b32.xlu0 %v1350_v17, %s2681_s14 }
 0x41c   : > { %1947 = vrot.lane.b32.xlu1 %v1351_v15, %s3170_s16  ;;  %v2382_v15 = vld [vmem:[%s3162_s5 + $0x38] sm:$0xff] }
 0x41e   : > { %1945 = vrot.lane.b32.xlu0 %v1350_v17, %s3170_s16 }
 0x420   : > { %2050 = vperm.xlu1 %2602, %v2376_v19  }
 0x422   : > { %2045 = vperm.xlu0 %2601, %v2375_v20  }
 0x476   : > { %v1426_v21 = vpop.permute.xlu1 %1425 }
 0x478   : > { %v1424_v22 = vpop.permute.xlu0 %1423 }
 0x479   : > { %2518 = vmatprep.mubr.msk.bf16.mxu0 %vm470_vm1, %v1424_v22 }
 0x47a   : > { %v1513_v24 = vpop.permute.xlu1 %1512  ;;  %2519 = vmatmul.mubr.msk.bf16.vlgmr.msra.gmra.mxu0 %vm470_vm1, %v1426_v21 }
 0x47b   : > { %2529 = vmatpush3.bf16.msra.mxu0 %v2618_v2 }
 0x47c   : > { %v1511_v25 = vpop.permute.xlu0 %1510  ;;  %2540 = vmatprep.subr.bf16.mxu0 %v2620_v23 }
 0x47d   : > { %2524 = vmatprep.mubr.msk.bf16.mxu1 %vm470_vm1, %v1511_v25 }
 0x47e   : > { %v1600_v27 = vpop.permute.xlu1 %1599  ;;  %2525 = vmatmul.mubr.msk.bf16.vlgmr.msra.gmra.mxu1 %vm470_vm1, %v1513_v24 }
 0x47f   : > { %2535 = vmatpush3.bf16.msra.mxu1 %v2619_v18 }
 0x480   : > { %v1598_v28 = vpop.permute.xlu0 %1597  ;;  %2546 = vmatprep.subr.bf16.mxu1 %v2621_v26 }
 0x481   : > { %2530 = vmatprep.mubr.msk.bf16.mxu0 %vm470_vm1, %v1598_v28 }
 0x482   : > { %v1687_v30 = vpop.permute.xlu1 %1686  ;;  %2531 = vmatmul.mubr.msk.bf16.vlgmr.msra.gmra.mxu0 %vm470_vm1, %v1600_v27 }
 0x483   : > { %2541 = vmatpush3.bf16.msra.mxu0 %v2620_v23 }
 0x484   : > { %v1685_v31 = vpop.permute.xlu0 %1684  ;;  %2552 = vmatprep.subr.bf16.mxu0 %v2622_v29 }
 0x485   : > { %2536 = vmatprep.mubr.msk.bf16.mxu1 %vm470_vm1, %v1685_v31 }
 0x486   : > { %v1774_v32 = vpop.permute.xlu1 %1773  ;;  %2537 = vmatmul.mubr.msk.bf16.vlgmr.msra.gmra.mxu1 %vm470_vm1, %v1687_v30 }
 0x487   : > { %2547 = vmatpush3.bf16.msra.mxu1 %v2621_v26 }
 0x488   : > { %v1772_v33 = vpop.permute.xlu0 %1771 }
 0x489   : > { %2542 = vmatprep.mubr.msk.bf16.mxu0 %vm470_vm1, %v1772_v33 }
 0x48a   : > { %2543 = vmatmul.mubr.msk.bf16.vlgmr.msra.gmra.mxu0 %vm470_vm1, %v1774_v32  ;;  %v1861_v34 = vpop.permute.xlu1 %1860 }
 0x48b   : > { %2553 = vmatpush3.bf16.msra.mxu0 %v2622_v29 }
 0x48c   : > { %v1859_v35 = vpop.permute.xlu0 %1858 }
 0x48d   : > { %2548 = vmatprep.mubr.msk.bf16.mxu1 %vm470_vm1, %v1859_v35 }
 0x48e   : > { %2549 = vmatmul.mubr.msk.bf16.vlgmr.msra.gmra.mxu1 %vm470_vm1, %v1861_v34  ;;  %v1948_v38 = vpop.permute.xlu1 %1947 }
 0x490   : > { %v1946_v36 = vpop.permute.xlu0 %1945 }
 0x491   : > { %2554 = vmatprep.mubr.msk.bf16.mxu0 %vm470_vm1, %v1946_v36 }
 0x492   : > { %2555 = vmatmul.mubr.msk.bf16.vlgmr.msra.gmra.mxu0 %vm470_vm1, %v1948_v38 }
 0x49b   : > { %v3100_v17 = vpop.permute.xlu1 %2050 }
 0x49d   : > { %v3098_v16 = vpop.permute.xlu0 %2045 }
 0x4c7   : > { %v2514_v39 = vpop.f32.mrf.mxu1 }
 0x4c8   : > { %1417 = vst.msk [vmem:[#allocation2 + $0x10] sm:$0xff] %vm470_vm1, %v2514_v39 }
 0x4c9   : > { %v1400_v37 = vpop.f32.mrf.mxu1 }
 0x4ca   : > { %1415 = vst.msk [vmem:[#allocation2] sm:$0xff] %vm470_vm1, %v1400_v37 }
 0x4cb   : > { %v2515_v40 = vpop.f32.mrf.mxu1 }
 0x4cc   : > { %1418 = vst.msk [vmem:[#allocation2 + $0x18] sm:$0xff] %vm470_vm1, %v2515_v40 }
 0x4cd   : > { %v1403_v41 = vpop.f32.mrf.mxu1 }
 0x4ce   : > { %1416 = vst.msk [vmem:[#allocation2 + $0x8] sm:$0xff] %vm470_vm1, %v1403_v41 }
 0x53a   : > { %v2520_v42 = vpop.f32.mrf.mxu0 }
 0x53b   : > { %1496 = vrot.lane.b32.xlu0 %v2520_v42, %s3170_s16 }
 0x53c   : > { %v1473_v43 = vpop.f32.mrf.mxu0 }
 0x53e   : > { %v2521_v44 = vpop.f32.mrf.mxu0  ;;  %v2526_v45 = vpop.f32.mrf.mxu1 }
 0x53f   : > { %1492 = vrot.lane.b32.xlu0 %v1473_v43, %s3170_s16  ;;  %1583 = vrot.lane.b32.xlu1 %v2526_v45, %s2681_s14 }
 0x540   : > { %v1560_v46 = vpop.f32.mrf.mxu1  ;;  %v1476_v47 = vpop.f32.mrf.mxu0 }
 0x542   : > { %v2527_v48 = vpop.f32.mrf.mxu1  ;;  %v2532_v49 = vpop.f32.mrf.mxu0 }
 0x543   : > { %1494 = vrot.lane.b32.xlu1 %v1476_v47, %s3170_s16  ;;  %1579 = vrot.lane.b32.xlu0 %v1560_v46, %s2681_s14 }
 0x544   : > { %v1563_v50 = vpop.f32.mrf.mxu1  ;;  %v1647_v51 = vpop.f32.mrf.mxu0 }
 0x546   : > { %v2538_v52 = vpop.f32.mrf.mxu1  ;;  %v2533_v53 = vpop.f32.mrf.mxu0 }
 0x547   : > { %1498 = vrot.lane.b32.xlu0 %v2521_v44, %s3170_s16  ;;  %1581 = vrot.lane.b32.xlu1 %v1563_v50, %s2681_s14  ;;  %s2383_s16 = sld [smem:[#allocation4 + $0x1]] }
 0x548   : > { %v1734_v54 = vpop.f32.mrf.mxu1  ;;  %v1650_v55 = vpop.f32.mrf.mxu0 }
 0x54a   : > { %v2539_v56 = vpop.f32.mrf.mxu1  ;;  %v2544_v4 = vpop.f32.mrf.mxu0 }
 0x54b   : > { %1585 = vrot.lane.b32.xlu0 %v2527_v48, %s2681_s14  ;;  %1670 = vrot.lane.b32.xlu1 %v2532_v49, %s2680_s13 }
 0x54c   : > { %v1737_v5 = vpop.f32.mrf.mxu1  ;;  %v1821_v8 = vpop.f32.mrf.mxu0 }
 0x54e   : > { %v2550_v60 = vpop.f32.mrf.mxu1  ;;  %v2545_v61 = vpop.f32.mrf.mxu0 }
 0x54f   : > { %1757 = vrot.lane.b32.xlu1 %v2538_v52, %s2679_s12  ;;  %1753 = vrot.lane.b32.xlu0 %v1734_v54, %s2679_s12 }
 0x550   : > { %v1908_v62 = vpop.f32.mrf.mxu1  ;;  %v1824_v63 = vpop.f32.mrf.mxu0 }
 0x552   : > { %v2551_v0 = vpop.f32.mrf.mxu1  ;;  %v2556_v1 = vpop.f32.mrf.mxu0 }
 0x553   : > { %1666 = vrot.lane.b32.xlu1 %v1647_v51, %s2680_s13  ;;  %1672 = vrot.lane.b32.xlu0 %v2533_v53, %s2680_s13 }
 0x554   : > { %v1911_v2 = vpop.f32.mrf.mxu1  ;;  %v1995_v3 = vpop.f32.mrf.mxu0 }
 0x556   : > { %v2557_v7 = vpop.f32.mrf.mxu0 }
 0x557   : > { %1759 = vrot.lane.b32.xlu0 %v2539_v56, %s2679_s12  ;;  %1755 = vrot.lane.b32.xlu1 %v1737_v5, %s2679_s12 }
 0x558   : > { %v1998_v10 = vpop.f32.mrf.mxu0 }
 0x55b   : > { %1668 = vrot.lane.b32.xlu0 %v1650_v55, %s2680_s13  ;;  %1844 = vrot.lane.b32.xlu1 %v2544_v4, %s2678_s11  ;;  %v2064_v55 = vmul.f32 %v3100_v17, %v2994_v6 }
 0x55f   : > { %1840 = vrot.lane.b32.xlu0 %v1821_v8, %s2678_s11  ;;  %1931 = vrot.lane.b32.xlu1 %v2550_v60, %s2677_s9  ;;  %v2063_v60 = vmul.f32 %v3098_v16, %v2992_v59 }
 0x563   : > { %1842 = vrot.lane.b32.xlu1 %v1824_v63, %s2678_s11  ;;  %1927 = vrot.lane.b32.xlu0 %v1908_v62, %s2677_s9 }
 0x567   : > { %1846 = vrot.lane.b32.xlu0 %v2545_v61, %s2678_s11  ;;  %1929 = vrot.lane.b32.xlu1 %v1911_v2, %s2677_s9 }
 0x56b   : > { %1933 = vrot.lane.b32.xlu0 %v2551_v0, %s2677_s9  ;;  %2018 = vrot.lane.b32.xlu1 %v2556_v1, %s2676_s27 }
 0x56f   : > { %2014 = vrot.lane.b32.xlu0 %v1995_v3, %s2676_s27  ;;  %2020 = vrot.lane.b32.xlu1 %v2557_v7, %s2676_s27 }
 0x573   : > { %2074 = vperm.xlu0 %2601, %v2379_v9   ;;  %2016 = vrot.lane.b32.xlu1 %v1998_v10, %s2676_s27 }
 0x577   : > { %2055 = vperm.xlu0 %2601, %v2377_v11   ;;  %2079 = vperm.xlu1 %2602, %v2380_v12  }
 0x57b   : > { %2060 = vperm.xlu0 %2601, %v2378_v13   ;;  %2084 = vperm.xlu1 %2602, %v2381_v14  }
 0x57f   : > { %2089 = vperm.xlu1 %2602, %v2382_v15  }
 0x5ad   : > { %v1497_v18 = vpop.permute.xlu0 %1496 }
 0x5ae   : > { %1506 = vst.msk [vmem:[#allocation2 + $0x10] sm:$0xff] %vm616_vm2, %v1497_v18 }
 0x5b1   : > { %v1493_v19 = vpop.permute.xlu0 %1492  ;;  %v1584_v20 = vpop.permute.xlu1 %1583 }
 0x5b2   : > { %1504 = vst.msk [vmem:[#allocation2] sm:$0xff] %vm616_vm2, %v1493_v19 }
 0x5b3   : > { %1593 = vst.msk [vmem:[#allocation2 + $0x10] sm:$0xff] %vm705_vm3, %v1584_v20  ;;  %v2110_v20 = vstv %s2383_s16 }
 0x5b5   : > { %v1495_v21 = vpop.permute.xlu1 %1494  ;;  %v1580_v22 = vpop.permute.xlu0 %1579 }
 0x5b6   : > { %1505 = vst.msk [vmem:[#allocation2 + $0x8] sm:$0xff] %vm616_vm2, %v1495_v21 }
 0x5b7   : > { %1591 = vst.msk [vmem:[#allocation2] sm:$0xff] %vm705_vm3, %v1580_v22 }
 0x5b9   : > { %v1499_v23 = vpop.permute.xlu0 %1498  ;;  %v1582_v24 = vpop.permute.xlu1 %1581 }
 0x5ba   : > { %1507 = vst.msk [vmem:[#allocation2 + $0x18] sm:$0xff] %vm616_vm2, %v1499_v23 }
 0x5bb   : > { %1592 = vst.msk [vmem:[#allocation2 + $0x8] sm:$0xff] %vm705_vm3, %v1582_v24 }
 0x5bd   : > { %v1586_v25 = vpop.permute.xlu0 %1585  ;;  %v1671_v26 = vpop.permute.xlu1 %1670 }
 0x5be   : > { %1594 = vst.msk [vmem:[#allocation2 + $0x18] sm:$0xff] %vm705_vm3, %v1586_v25 }
 0x5bf   : > { %1680 = vst.msk [vmem:[#allocation2 + $0x10] sm:$0xff] %vm794_vm4, %v1671_v26 }
 0x5c1   : > { %v1758_v27 = vpop.permute.xlu1 %1757  ;;  %v1754_v28 = vpop.permute.xlu0 %1753 }
 0x5c2   : > { %1767 = vst.msk [vmem:[#allocation2 + $0x10] sm:$0xff] %vm883_vm5, %v1758_v27 }
 0x5c5   : > { %v1667_v29 = vpop.permute.xlu1 %1666  ;;  %v1673_v30 = vpop.permute.xlu0 %1672 }
 0x5c6   : > { %1678 = vst.msk [vmem:[#allocation2] sm:$0xff] %vm794_vm4, %v1667_v29  ;;  %1681 = vst.msk [vmem:[#allocation2 + $0x18] sm:$0xff] %vm794_vm4, %v1673_v30 }
 0x5c7   : > { %1765 = vst.msk [vmem:[#allocation2] sm:$0xff] %vm883_vm5, %v1754_v28 }
 0x5c9   : > { %v1760_v31 = vpop.permute.xlu0 %1759  ;;  %v1756_v32 = vpop.permute.xlu1 %1755 }
 0x5ca   : > { %1768 = vst.msk [vmem:[#allocation2 + $0x18] sm:$0xff] %vm883_vm5, %v1760_v31 }
 0x5cd   : > { %v1669_v33 = vpop.permute.xlu0 %1668  ;;  %v1845_v34 = vpop.permute.xlu1 %1844 }
 0x5ce   : > { %1679 = vst.msk [vmem:[#allocation2 + $0x8] sm:$0xff] %vm794_vm4, %v1669_v33 }
 0x5cf   : > { %1854 = vst.msk [vmem:[#allocation2 + $0x10] sm:$0xff] %vm972_vm6, %v1845_v34 }
 0x5d0   : > { %1766 = vst.msk [vmem:[#allocation2 + $0x8] sm:$0xff] %vm883_vm5, %v1756_v32 }
 0x5d1   : > { %v1841_v35 = vpop.permute.xlu0 %1840  ;;  %v1932_v36 = vpop.permute.xlu1 %1931 }
 0x5d2   : > { %1852 = vst.msk [vmem:[#allocation2] sm:$0xff] %vm972_vm6, %v1841_v35 }
 0x5d3   : > { %1941 = vst.msk [vmem:[#allocation2 + $0x10] sm:$0xff] %vm1061_vm7, %v1932_v36 }
 0x5d5   : > { %v1843_v38 = vpop.permute.xlu1 %1842  ;;  %v1928_v39 = vpop.permute.xlu0 %1927 }
 0x5d6   : > { %1853 = vst.msk [vmem:[#allocation2 + $0x8] sm:$0xff] %vm972_vm6, %v1843_v38 }
 0x5d7   : > { %1939 = vst.msk [vmem:[#allocation2] sm:$0xff] %vm1061_vm7, %v1928_v39 }
 0x5d9   : > { %v1847_v37 = vpop.permute.xlu0 %1846  ;;  %v1930_v40 = vpop.permute.xlu1 %1929 }
 0x5da   : > { %1855 = vst.msk [vmem:[#allocation2 + $0x18] sm:$0xff] %vm972_vm6, %v1847_v37 }
 0x5db   : > { %1940 = vst.msk [vmem:[#allocation2 + $0x8] sm:$0xff] %vm1061_vm7, %v1930_v40 }
 0x5dd   : > { %v1934_v41 = vpop.permute.xlu0 %1933  ;;  %v2019_v42 = vpop.permute.xlu1 %2018 }
 0x5de   : > { %1942 = vst.msk [vmem:[#allocation2 + $0x18] sm:$0xff] %vm1061_vm7, %v1934_v41 }
 0x5df   : > { %2028 = vst.msk [vmem:[#allocation2 + $0x10] sm:$0xff] %vm1150_vm8, %v2019_v42 }
 0x5e1   : > { %v2015_v43 = vpop.permute.xlu0 %2014  ;;  %v2021_v44 = vpop.permute.xlu1 %2020 }
 0x5e2   : > { %2026 = vst.msk [vmem:[#allocation2] sm:$0xff] %vm1150_vm8, %v2015_v43  ;;  %2029 = vst.msk [vmem:[#allocation2 + $0x18] sm:$0xff] %vm1150_vm8, %v2021_v44 }
 0x5e5   : > { %v2017_v45 = vpop.permute.xlu1 %2016 }
 0x5e6   : > { %2027 = vst.msk [vmem:[#allocation2 + $0x8] sm:$0xff] %vm1150_vm8, %v2017_v45  ;;  %v2032_v52 = vld [vmem:[#allocation2 + $0x10] sm:$0xff] }
 0x5e7   : > { %v2036_v4 = vmax.f32 %v2032_v52, 0.0 }
 0x5e9   : > { %v2030_v48 = vld [vmem:[#allocation2] sm:$0xff]  ;;  %v2033_v8 = vld [vmem:[#allocation2 + $0x18] sm:$0xff]  ;;  %v2120_v28 = vsub.f32 %v2988_v57, %v2036_v4 }
 0x5ea   : > { %v2034_v53 = vmax.f32 %v2030_v48, 0.0  ;;  %v2037_v3 = vmax.f32 %v2033_v8, 0.0 }
 0x5ec   : > { %v2118_v26 = vsub.f32 %v2992_v59, %v2034_v53  ;;  %v2121_v29 = vsub.f32 %v2990_v58, %v2037_v3 }
 0x5ed   : > { %v2031_v47 = vld [vmem:[#allocation2 + $0x8] sm:$0xff] }
 0x5ee   : > { %v2075_v46 = vpop.permute.xlu0 %2074  ;;  %v2035_v49 = vmax.f32 %v2031_v47, 0.0 }
 0x5ef   : > { %v2092_v56 = vmul.f32 %v2075_v46, %v2034_v53 }
 0x5f0   : > { %v2119_v27 = vsub.f32 %v2994_v6, %v2035_v49 }
 0x5f1   : > { %v2096_v1 = vadd.f32 %v2092_v56, %v2063_v60 }
 0x5f2   : > { %v2056_v50 = vpop.permute.xlu0 %2055  ;;  %v2080_v51 = vpop.permute.xlu1 %2079 }
 0x5f3   : > { %v2093_v54 = vmul.f32 %v2080_v51, %v2035_v49  ;;  %v2065_v61 = vmul.f32 %v2056_v50, %v2988_v57 }
 0x5f5   : > { %v2097_v62 = vadd.f32 %v2093_v54, %v2064_v55 }
 0x5f6   : > { %v2085_v5 = vpop.permute.xlu1 %2084  ;;  %v2061_v0 = vpop.permute.xlu0 %2060 }
 0x5f7   : > { %v2094_v63 = vmul.f32 %v2085_v5, %v2036_v4  ;;  %v2100_v9 = vadd.f32 %v2097_v62, %v2096_v1  ;;  %v2066_v10 = vmul.f32 %v2061_v0, %v2990_v58 }
 0x5f9   : > { %v2098_v2 = vadd.f32 %v2094_v63, %v2065_v61 }
 0x5fa   : > { %v2090_v7 = vpop.permute.xlu1 %2089 }
 0x5fb   : > { %v2095_v11 = vmul.f32 %v2090_v7, %v2037_v3  ;;  %v2101_v12 = vadd.f32 %v2100_v9, %v2098_v2 }
 0x5fd   : > { %v2099_v13 = vadd.f32 %v2095_v11, %v2066_v10 }
 0x5ff   : > { %v2102_v14 = vadd.f32 %v2101_v12, %v2099_v13 }
 0x601   : > { %v2103_v15 = vrot.slane %v2102_v14, 4 }
 0x603   : > { %v2104_v17 = vadd.f32 %v2103_v15, %v2102_v14 }
 0x605   : > { %v2105_v16 = vrot.slane %v2104_v17, 2 }
 0x607   : > { %v2106_v18 = vadd.f32 %v2105_v16, %v2104_v17 }
 0x609   : > { %v2107_v19 = vrot.slane %v2106_v18, 1 }
 0x60b   : > { %v2108_v21 = vadd.f32 %v2107_v19, %v2106_v18 }
 0x60d   : > { %v2111_v22 = vadd.f32 %v2110_v20, %v2108_v21 }
 0x60f   : > { %v2384_v23 = vmul.f32 -1.442695, %v2111_v22 }
 0x611   : > { %2627 = vpow2.f32 %v2384_v23 }
 0x61e   : > { %v2628_v24 = vpop.eup %2627 }
 0x61f   : > { %v2115_v25 = vadd.f32 1.0, %v2628_v24 }
 0x621   : > { %2629 = vrcp.f32 %v2115_v25 }
 0x62e   : > { %v2630_v30 = vpop.eup %2629 }
 0x62f   : > { %v2122_v31 = vmul.f32 %v2630_v30, %v2118_v26  ;;  %v2123_v32 = vmul.f32 %v2630_v30, %v2119_v27  ;;  %v2124_v33 = vmul.f32 %v2630_v30, %v2120_v28  ;;  %v2125_v34 = vmul.f32 %v2630_v30, %v2121_v29 }
 0x630   : > { %2140 = sbr.rel (!%p3171_p5) target bundleno = 1597 (0x63d), region = 94 }
 0x631   : > { %v2126_v35 = vadd.f32 %v2122_v31, %v2034_v53  ;;  %v2127_v36 = vadd.f32 %v2123_v32, %v2035_v49  ;;  %v2128_v38 = vadd.f32 %v2124_v33, %v2036_v4  ;;  %v2129_v39 = vadd.f32 %v2125_v34, %v2037_v3 }
 0x633   : > { %2130 = vst [vmem:[%s351_s17] sm:$0xff] %v2126_v35  ;;  %2131 = vst [vmem:[%s351_s17 + $0x8] sm:$0xff] %v2127_v36 }
 0x634   : > { %2132 = vst [vmem:[%s351_s17 + $0x10] sm:$0xff] %v2128_v38  ;;  %2133 = vst [vmem:[%s351_s17 + $0x18] sm:$0xff] %v2129_v39 }
 0x63a   : > { %v2177_v57 = vld [vmem:[%s351_s17] sm:$0xff]  ;;  %v2179_v58 = vld [vmem:[%s351_s17 + $0x8] sm:$0xff] }
 0x63b   : > { %v2181_v59 = vld [vmem:[%s351_s17 + $0x10] sm:$0xff]  ;;  %2178 = vst [vmem:[%s2142_s20] sm:$0xff] %v2177_v57  ;;  %2180 = vst [vmem:[%s2142_s20 + $0x10] sm:$0xff] %v2179_v58  ;;  %v2183_v6 = vld [vmem:[%s351_s17 + $0x18] sm:$0xff] }
 0x63c   : > { %2182 = vst [vmem:[%s2142_s20 + $0x20] sm:$0xff] %v2181_v59  ;;  %2184 = vst [vmem:[%s2142_s20 + $0x30] sm:$0xff] %v2183_v6 }
 0x63d PF: > { %p15_p8 = scmp.ge.s32.totalorder %s2742_s28, 4   ;;  %s3172_s24 = smov %s2668_s25 }
 0x63e   : > { %s3173_s25 = smov %s2752_s8  ;;  %s3174_s26 = smov %s2742_s28 }
 0x63f   :  { %17 = sbr.rel (!%p15_p8) target bundleno = 2 (0x2), region = 178 }
 0x644   :  { %2200 = vsyncpa [#allocation5], 1 }
 0x645   :  { %2202 = vsyncpa [#allocation5 + $0x1], 1 }

</bundles_post_ra>
